<compile_context>
chip_gen: v7x
topology: tpu7x:2x2x1
jax: 0.10.0
libtpu: 0.0.40
codegen_flags: <defaults>
</compile_context>

<pallas_src>
import jax
import jax.numpy as jnp
import numpy as np
from jax import lax
from jax.experimental import pallas as pl
from jax.experimental.pallas import tpu as pltpu


# ---------------------------------------------------------------------------
# Kernel factory: fused 1x1 conv + feature-adjacency application
# ---------------------------------------------------------------------------
def _make_kernel(C, OC, F, per_sample_adj):
    use_mxu = F >= 128  # only route the F-contraction to the MXU when it can fill it

    def kernel(x_ref, adj_ref, w_ref, b_ref, out_ref):
        # x_ref:   (TB, C, F)   VMEM
        # adj_ref: (TB, F, F)   VMEM (per-sample)   or (F, F) grid-invariant (shared)
        # w_ref:   (OC*C,)      SMEM scalars (Conv1d weight, row-major [o, c])
        # b_ref:   (OC,)        SMEM scalars (Conv1d bias)
        # out_ref: (TB, OC, F)  VMEM

        # ---- 1x1 conv, unrolled over (o, c): pure scalar*vector VALU work ----
        xs = [x_ref[:, c, :] for c in range(C)]            # C x (TB, F)
        ys = []
        for o in range(OC):
            y_o = xs[0] * w_ref[o * C + 0]
            for c in range(1, C):
                y_o = y_o + xs[c] * w_ref[o * C + c]
            ys.append(y_o + b_ref[o])                       # (TB, F)

        adjm = adj_ref[...]                                  # (TB,F,F) or (F,F)

        # ---- feature broadcast: out[t, o, a] = sum_f y[t, o, f] * adj[., a, f] ----
        if per_sample_adj:
            if use_mxu:
                # Batched matmuls on the MXU (worthwhile only at F >= 128).
                y = jnp.stack(ys, axis=1)                    # (TB, OC, F)
                out = jnp.einsum('tof,taf->toa', y, adjm,
                                 preferred_element_type=jnp.float32)
                out_ref[...] = out.astype(out_ref.dtype)
            else:
                for o in range(OC):
                    # (TB,1,F) * (TB,F,F) -> sum over f -> (TB, F)
                    out_o = jnp.sum(ys[o][:, None, :] * adjm, axis=-1)
                    out_ref[:, o, :] = out_o.astype(out_ref.dtype)
        else:
            for o in range(OC):
                if use_mxu:
                    # Big-M matmul: M = TB rows against the shared (F, F) adj.
                    out_o = lax.dot_general(
                        ys[o], adjm,
                        dimension_numbers=(((1,), (1,)), ((), ())),
                        preferred_element_type=jnp.float32)   # (TB, F)
                else:
                    out_o = jnp.sum(ys[o][:, None, :] * adjm[None, :, :], axis=-1)
                out_ref[:, o, :] = out_o.astype(out_ref.dtype)

    return kernel


# ---------------------------------------------------------------------------
# VMEM budgeting (padded-tile accounting, generation-aware)
# ---------------------------------------------------------------------------
def _round_up(n, m):
    return -(-n // m) * m


def _vmem_budget_and_limit():
    """Generation-aware VMEM budget for block sizing + matching scoped limit."""
    try:
        phys = int(pltpu.get_tpu_info().vmem_capacity_bytes)
    except Exception:
        phys = 64 << 20                      # conservative: v7x per-TensorCore VMEM
    limit = min(phys // 2, 48 << 20)         # scoped VMEM we request from Mosaic
    budget = (3 * limit) // 4                # headroom for temps / compiler scratch
    return budget, limit


def _pick_block_batch(N, C, F, OC, per_sample_adj, vmem_budget_bytes):
    """Largest batch block (divisor of N) whose *padded* tiles fit the budget."""
    Fp = _round_up(F, 128)
    x_blk = _round_up(C, 8) * Fp * 4                          # f32 bytes / sample
    out_blk = _round_up(OC, 8) * Fp * 4
    adj_blk = _round_up(F, 8) * Fp * 4 if per_sample_adj else 0
    tmp_blk = _round_up(F, 8) * Fp * 4 if F < 128 else 0      # VPU contraction temp
    per_sample = 2 * (x_blk + out_blk + adj_blk) + tmp_blk    # x2: double buffering
    fixed = 0 if per_sample_adj else 2 * _round_up(F, 8) * Fp * 4   # shared adj block
    usable = max(vmem_budget_bytes - fixed, per_sample)
    tb = max(1, min(N, usable // per_sample))
    while N % tb:                                              # fewest grid steps
        tb -= 1
    return tb


# ---------------------------------------------------------------------------
# Wrapper
# ---------------------------------------------------------------------------
def feat_brd_1d(x, adj, weight, bias, *, block_batch=None):
    """FeatBrd1d forward.

    x:      (N, C, F)  float32
    adj:    (N, F, F)  per-sample feature adjacency, or (F, F) shared buffer
            (the module's registered `self.adjacency` path).
    weight: (OC, C, 1) or (OC, C)  Conv1d(kernel_size=1) weight
    bias:   (OC,)                  Conv1d bias
    returns (N, OC, F)
    """
    N, C, F = x.shape
    OC = int(weight.shape[0])
    per_sample_adj = adj.ndim == 3

    x = x.astype(jnp.float32)
    adj = adj.astype(jnp.float32)
    w_flat = weight.reshape(OC * C).astype(jnp.float32)      # SMEM scalars
    b_flat = bias.reshape(OC).astype(jnp.float32)            # SMEM scalars

    budget, vmem_limit = _vmem_budget_and_limit()
    TB = block_batch if block_batch is not None else _pick_block_batch(
        N, C, F, OC, per_sample_adj, budget)
    assert N % TB == 0, "batch must be divisible by block_batch"
    NB = N // TB

    if per_sample_adj:
        adj_spec = pl.BlockSpec((TB, F, F), lambda b: (b, 0, 0))
    else:
        # Grid-invariant shared adjacency: no N x HBM broadcast, fetched once.
        adj_spec = pl.BlockSpec((F, F), lambda b: (0, 0))

    kernel = _make_kernel(C, OC, F, per_sample_adj)

    return pl.pallas_call(
        kernel,
        out_shape=jax.ShapeDtypeStruct((N, OC, F), jnp.float32),
        grid=(NB,),
        in_specs=[
            pl.BlockSpec((TB, C, F), lambda b: (b, 0, 0)),
            adj_spec,
            pl.BlockSpec(memory_space=pltpu.MemorySpace.SMEM),   # weight (OC*C,)
            pl.BlockSpec(memory_space=pltpu.MemorySpace.SMEM),   # bias   (OC,)
        ],
        out_specs=pl.BlockSpec((TB, OC, F), lambda b: (b, 0, 0)),
        compiler_params=pltpu.CompilerParams(
            dimension_semantics=("parallel",),
            vmem_limit_bytes=vmem_limit),
    )(x, adj, w_flat, b_flat)


# ---------------------------------------------------------------------------
# Pure-JAX reference (mirrors the PyTorch semantics) for correctness checking
# ---------------------------------------------------------------------------
def reference(x, adj, weight, bias):
    N, C, F = x.shape
    OC = weight.shape[0]
    w2 = weight.reshape(OC, C)
    y = jnp.einsum('oc,ncf->nof', w2, x) + bias.reshape(1, OC, 1)   # Conv1d k=1
    if adj.ndim == 2:
        adj = jnp.broadcast_to(adj, (N, F, F))
    return jnp.einsum('naf,nof->noa', adj, y)                        # (N, OC, F)


if __name__ == "__main__":
    # Small shapes consistent with the module: batch=8, in_channels=4,
    # n_features=16, out_channels=4.
    N, C, F, OC = 8, 4, 16, 4

    key = jax.random.PRNGKey(0)
    kx, ka, kw, kb = jax.random.split(key, 4)

    x = jax.random.normal(kx, (N, C, F), jnp.float32)

    # A plausible per-sample symmetric, normalized feature adjacency.
    a = jax.random.normal(ka, (N, F, F), jnp.float32)
    adj = a + jnp.swapaxes(a, -1, -2)
    adj = adj / (jnp.abs(adj).sum(-2, keepdims=True) + 1e-7)

    # Conv1d(C, OC, kernel_size=1) parameters (PyTorch default uniform bounds).
    bound = 1.0 / np.sqrt(C * 1)
    weight = jax.random.uniform(kw, (OC, C, 1), jnp.float32, -bound, bound)
    bias = jax.random.uniform(kb, (OC,), jnp.float32, -bound, bound)

    # Path 1: per-sample adjacency (forward(x, adj)).
    out = feat_brd_1d(x, adj, weight, bias)
    jax.block_until_ready(out)
    np.testing.assert_allclose(np.asarray(out),
                               np.asarray(reference(x, adj, weight, bias)),
                               rtol=1e-4, atol=1e-5)

    # Path 2: shared registered adjacency buffer (forward(x) with self.adjacency),
    # passed grid-invariant (no N x broadcast in HBM).
    adj_shared = adj[0]
    out2 = feat_brd_1d(x, adj_shared, weight, bias)
    jax.block_until_ready(out2)
    np.testing.assert_allclose(np.asarray(out2),
                               np.asarray(reference(x, adj_shared, weight, bias)),
                               rtol=1e-4, atol=1e-5)

    print("KERNEL_OK")
</pallas_src>

<mosaic_0001>
module attributes {stable_mosaic.version = 11 : i64} {
  func.func @kernel(%arg0: i32, %arg1: memref<8x4x16xf32, #tpu.memory_space<vmem>>, %arg2: memref<8x16x16xf32, #tpu.memory_space<vmem>>, %arg3: memref<16xf32, #tpu.memory_space<smem>>, %arg4: memref<4xf32, #tpu.memory_space<smem>>, %arg5: memref<8x4x16xf32, #tpu.memory_space<vmem>>) attributes {dimension_semantics = [#tpu.dimension_semantics<parallel>], iteration_bounds = array<i64: 1>, scalar_prefetch = 0 : i64, scratch_operands = 0 : i64, tpu.core_type = #tpu.core_type<tc>, window_params = [{transform_indices = @transform_0, window_bounds = array<i64: 8, 4, 16>}, {transform_indices = @transform_1, window_bounds = array<i64: 8, 16, 16>}, {transform_indices = @transform_2, window_bounds = array<i64: 16>}, {transform_indices = @transform_3, window_bounds = array<i64: 4>}, {transform_indices = @transform_4, window_bounds = array<i64: 8, 4, 16>}]} {
    %c0 = arith.constant 0 : index
    %c0_0 = arith.constant 0 : index
    %c0_1 = arith.constant 0 : index
    %0 = vector.load %arg1[%c0, %c0_0, %c0_1] : memref<8x4x16xf32, #tpu.memory_space<vmem>>, vector<8x1x16xf32>
    %1 = vector.shape_cast %0 : vector<8x1x16xf32> to vector<8x16xf32>
    %c0_2 = arith.constant 0 : index
    %c1 = arith.constant 1 : index
    %c0_3 = arith.constant 0 : index
    %2 = vector.load %arg1[%c0_2, %c1, %c0_3] : memref<8x4x16xf32, #tpu.memory_space<vmem>>, vector<8x1x16xf32>
    %3 = vector.shape_cast %2 : vector<8x1x16xf32> to vector<8x16xf32>
    %c0_4 = arith.constant 0 : index
    %c2 = arith.constant 2 : index
    %c0_5 = arith.constant 0 : index
    %4 = vector.load %arg1[%c0_4, %c2, %c0_5] : memref<8x4x16xf32, #tpu.memory_space<vmem>>, vector<8x1x16xf32>
    %5 = vector.shape_cast %4 : vector<8x1x16xf32> to vector<8x16xf32>
    %c0_6 = arith.constant 0 : index
    %c3 = arith.constant 3 : index
    %c0_7 = arith.constant 0 : index
    %6 = vector.load %arg1[%c0_6, %c3, %c0_7] : memref<8x4x16xf32, #tpu.memory_space<vmem>>, vector<8x1x16xf32>
    %7 = vector.shape_cast %6 : vector<8x1x16xf32> to vector<8x16xf32>
    %c0_8 = arith.constant 0 : index
    %8 = memref.load %arg3[%c0_8] : memref<16xf32, #tpu.memory_space<smem>>
    %9 = vector.broadcast %8 : f32 to vector<8x16xf32>
    %10 = arith.mulf %1, %9 : vector<8x16xf32>
    %c1_9 = arith.constant 1 : index
    %11 = memref.load %arg3[%c1_9] : memref<16xf32, #tpu.memory_space<smem>>
    %12 = vector.broadcast %11 : f32 to vector<8x16xf32>
    %13 = arith.mulf %3, %12 : vector<8x16xf32>
    %14 = arith.addf %10, %13 : vector<8x16xf32>
    %c2_10 = arith.constant 2 : index
    %15 = memref.load %arg3[%c2_10] : memref<16xf32, #tpu.memory_space<smem>>
    %16 = vector.broadcast %15 : f32 to vector<8x16xf32>
    %17 = arith.mulf %5, %16 : vector<8x16xf32>
    %18 = arith.addf %14, %17 : vector<8x16xf32>
    %c3_11 = arith.constant 3 : index
    %19 = memref.load %arg3[%c3_11] : memref<16xf32, #tpu.memory_space<smem>>
    %20 = vector.broadcast %19 : f32 to vector<8x16xf32>
    %21 = arith.mulf %7, %20 : vector<8x16xf32>
    %22 = arith.addf %18, %21 : vector<8x16xf32>
    %c0_12 = arith.constant 0 : index
    %23 = memref.load %arg4[%c0_12] : memref<4xf32, #tpu.memory_space<smem>>
    %24 = vector.broadcast %23 : f32 to vector<8x16xf32>
    %25 = arith.addf %22, %24 : vector<8x16xf32>
    %c4 = arith.constant 4 : index
    %26 = memref.load %arg3[%c4] : memref<16xf32, #tpu.memory_space<smem>>
    %27 = vector.broadcast %26 : f32 to vector<8x16xf32>
    %28 = arith.mulf %1, %27 : vector<8x16xf32>
    %c5 = arith.constant 5 : index
    %29 = memref.load %arg3[%c5] : memref<16xf32, #tpu.memory_space<smem>>
    %30 = vector.broadcast %29 : f32 to vector<8x16xf32>
    %31 = arith.mulf %3, %30 : vector<8x16xf32>
    %32 = arith.addf %28, %31 : vector<8x16xf32>
    %c6 = arith.constant 6 : index
    %33 = memref.load %arg3[%c6] : memref<16xf32, #tpu.memory_space<smem>>
    %34 = vector.broadcast %33 : f32 to vector<8x16xf32>
    %35 = arith.mulf %5, %34 : vector<8x16xf32>
    %36 = arith.addf %32, %35 : vector<8x16xf32>
    %c7 = arith.constant 7 : index
    %37 = memref.load %arg3[%c7] : memref<16xf32, #tpu.memory_space<smem>>
    %38 = vector.broadcast %37 : f32 to vector<8x16xf32>
    %39 = arith.mulf %7, %38 : vector<8x16xf32>
    %40 = arith.addf %36, %39 : vector<8x16xf32>
    %c1_13 = arith.constant 1 : index
    %41 = memref.load %arg4[%c1_13] : memref<4xf32, #tpu.memory_space<smem>>
    %42 = vector.broadcast %41 : f32 to vector<8x16xf32>
    %43 = arith.addf %40, %42 : vector<8x16xf32>
    %c8 = arith.constant 8 : index
    %44 = memref.load %arg3[%c8] : memref<16xf32, #tpu.memory_space<smem>>
    %45 = vector.broadcast %44 : f32 to vector<8x16xf32>
    %46 = arith.mulf %1, %45 : vector<8x16xf32>
    %c9 = arith.constant 9 : index
    %47 = memref.load %arg3[%c9] : memref<16xf32, #tpu.memory_space<smem>>
    %48 = vector.broadcast %47 : f32 to vector<8x16xf32>
    %49 = arith.mulf %3, %48 : vector<8x16xf32>
    %50 = arith.addf %46, %49 : vector<8x16xf32>
    %c10 = arith.constant 10 : index
    %51 = memref.load %arg3[%c10] : memref<16xf32, #tpu.memory_space<smem>>
    %52 = vector.broadcast %51 : f32 to vector<8x16xf32>
    %53 = arith.mulf %5, %52 : vector<8x16xf32>
    %54 = arith.addf %50, %53 : vector<8x16xf32>
    %c11 = arith.constant 11 : index
    %55 = memref.load %arg3[%c11] : memref<16xf32, #tpu.memory_space<smem>>
    %56 = vector.broadcast %55 : f32 to vector<8x16xf32>
    %57 = arith.mulf %7, %56 : vector<8x16xf32>
    %58 = arith.addf %54, %57 : vector<8x16xf32>
    %c2_14 = arith.constant 2 : index
    %59 = memref.load %arg4[%c2_14] : memref<4xf32, #tpu.memory_space<smem>>
    %60 = vector.broadcast %59 : f32 to vector<8x16xf32>
    %61 = arith.addf %58, %60 : vector<8x16xf32>
    %c12 = arith.constant 12 : index
    %62 = memref.load %arg3[%c12] : memref<16xf32, #tpu.memory_space<smem>>
    %63 = vector.broadcast %62 : f32 to vector<8x16xf32>
    %64 = arith.mulf %1, %63 : vector<8x16xf32>
    %c13 = arith.constant 13 : index
    %65 = memref.load %arg3[%c13] : memref<16xf32, #tpu.memory_space<smem>>
    %66 = vector.broadcast %65 : f32 to vector<8x16xf32>
    %67 = arith.mulf %3, %66 : vector<8x16xf32>
    %68 = arith.addf %64, %67 : vector<8x16xf32>
    %c14 = arith.constant 14 : index
    %69 = memref.load %arg3[%c14] : memref<16xf32, #tpu.memory_space<smem>>
    %70 = vector.broadcast %69 : f32 to vector<8x16xf32>
    %71 = arith.mulf %5, %70 : vector<8x16xf32>
    %72 = arith.addf %68, %71 : vector<8x16xf32>
    %c15 = arith.constant 15 : index
    %73 = memref.load %arg3[%c15] : memref<16xf32, #tpu.memory_space<smem>>
    %74 = vector.broadcast %73 : f32 to vector<8x16xf32>
    %75 = arith.mulf %7, %74 : vector<8x16xf32>
    %76 = arith.addf %72, %75 : vector<8x16xf32>
    %c3_15 = arith.constant 3 : index
    %77 = memref.load %arg4[%c3_15] : memref<4xf32, #tpu.memory_space<smem>>
    %78 = vector.broadcast %77 : f32 to vector<8x16xf32>
    %79 = arith.addf %76, %78 : vector<8x16xf32>
    %c0_16 = arith.constant 0 : index
    %c0_17 = arith.constant 0 : index
    %c0_18 = arith.constant 0 : index
    %80 = vector.load %arg2[%c0_16, %c0_17, %c0_18] : memref<8x16x16xf32, #tpu.memory_space<vmem>>, vector<8x16x16xf32>
    %81 = vector.shape_cast %25 : vector<8x16xf32> to vector<8x1x16xf32>
    %82 = vector.broadcast %81 : vector<8x1x16xf32> to vector<8x16x16xf32>
    %83 = arith.mulf %82, %80 : vector<8x16x16xf32>
    %cst = arith.constant dense<0.000000e+00> : vector<8x16xf32>
    %84 = vector.multi_reduction <add>, %83, %cst [2] : vector<8x16x16xf32> to vector<8x16xf32>
    %c0_19 = arith.constant 0 : index
    %c0_20 = arith.constant 0 : index
    %c0_21 = arith.constant 0 : index
    %85 = vector.load %arg5[%c0_19, %c0_20, %c0_21] : memref<8x4x16xf32, #tpu.memory_space<vmem>>, vector<8x1x16xf32>
    %86 = vector.shape_cast %85 : vector<8x1x16xf32> to vector<8x16xf32>
    %87 = vector.shape_cast %84 : vector<8x16xf32> to vector<8x1x16xf32>
    tpu.vector_store %arg5[%c0_19, %c0_20, %c0_21], %87 {strides = array<i32>} : memref<8x4x16xf32, #tpu.memory_space<vmem>>, vector<8x1x16xf32>,
    %88 = vector.shape_cast %43 : vector<8x16xf32> to vector<8x1x16xf32>
    %89 = vector.broadcast %88 : vector<8x1x16xf32> to vector<8x16x16xf32>
    %90 = arith.mulf %89, %80 : vector<8x16x16xf32>
    %cst_22 = arith.constant dense<0.000000e+00> : vector<8x16xf32>
    %91 = vector.multi_reduction <add>, %90, %cst_22 [2] : vector<8x16x16xf32> to vector<8x16xf32>
    %c0_23 = arith.constant 0 : index
    %c1_24 = arith.constant 1 : index
    %c0_25 = arith.constant 0 : index
    %92 = vector.load %arg5[%c0_23, %c1_24, %c0_25] : memref<8x4x16xf32, #tpu.memory_space<vmem>>, vector<8x1x16xf32>
    %93 = vector.shape_cast %92 : vector<8x1x16xf32> to vector<8x16xf32>
    %94 = vector.shape_cast %91 : vector<8x16xf32> to vector<8x1x16xf32>
    tpu.vector_store %arg5[%c0_23, %c1_24, %c0_25], %94 {strides = array<i32>} : memref<8x4x16xf32, #tpu.memory_space<vmem>>, vector<8x1x16xf32>,
    %95 = vector.shape_cast %61 : vector<8x16xf32> to vector<8x1x16xf32>
    %96 = vector.broadcast %95 : vector<8x1x16xf32> to vector<8x16x16xf32>
    %97 = arith.mulf %96, %80 : vector<8x16x16xf32>
    %cst_26 = arith.constant dense<0.000000e+00> : vector<8x16xf32>
    %98 = vector.multi_reduction <add>, %97, %cst_26 [2] : vector<8x16x16xf32> to vector<8x16xf32>
    %c0_27 = arith.constant 0 : index
    %c2_28 = arith.constant 2 : index
    %c0_29 = arith.constant 0 : index
    %99 = vector.load %arg5[%c0_27, %c2_28, %c0_29] : memref<8x4x16xf32, #tpu.memory_space<vmem>>, vector<8x1x16xf32>
    %100 = vector.shape_cast %99 : vector<8x1x16xf32> to vector<8x16xf32>
    %101 = vector.shape_cast %98 : vector<8x16xf32> to vector<8x1x16xf32>
    tpu.vector_store %arg5[%c0_27, %c2_28, %c0_29], %101 {strides = array<i32>} : memref<8x4x16xf32, #tpu.memory_space<vmem>>, vector<8x1x16xf32>,
    %102 = vector.shape_cast %79 : vector<8x16xf32> to vector<8x1x16xf32>
    %103 = vector.broadcast %102 : vector<8x1x16xf32> to vector<8x16x16xf32>
    %104 = arith.mulf %103, %80 : vector<8x16x16xf32>
    %cst_30 = arith.constant dense<0.000000e+00> : vector<8x16xf32>
    %105 = vector.multi_reduction <add>, %104, %cst_30 [2] : vector<8x16x16xf32> to vector<8x16xf32>
    %c0_31 = arith.constant 0 : index
    %c3_32 = arith.constant 3 : index
    %c0_33 = arith.constant 0 : index
    %106 = vector.load %arg5[%c0_31, %c3_32, %c0_33] : memref<8x4x16xf32, #tpu.memory_space<vmem>>, vector<8x1x16xf32>
    %107 = vector.shape_cast %106 : vector<8x1x16xf32> to vector<8x16xf32>
    %108 = vector.shape_cast %105 : vector<8x16xf32> to vector<8x1x16xf32>
    tpu.vector_store %arg5[%c0_31, %c3_32, %c0_33], %108 {strides = array<i32>} : memref<8x4x16xf32, #tpu.memory_space<vmem>>, vector<8x1x16xf32>,
    return
  }
  func.func @transform_0(%arg0: i32) -> (i32, i32, i32) {
    %c0_i32 = arith.constant 0 : i32
    %c0_i32_0 = arith.constant 0 : i32
    %c0_i32_1 = arith.constant 0 : i32
    return %arg0, %c0_i32, %c0_i32_0 : i32, i32, i32
  }
  func.func @transform_1(%arg0: i32) -> (i32, i32, i32) {
    %c0_i32 = arith.constant 0 : i32
    %c0_i32_0 = arith.constant 0 : i32
    %c0_i32_1 = arith.constant 0 : i32
    return %arg0, %c0_i32, %c0_i32_0 : i32, i32, i32
  }
  func.func @transform_2(%arg0: i32) -> i32 {
    %c0_i32 = arith.constant 0 : i32
    %c0_i32_0 = arith.constant 0 : i32
    return %c0_i32 : i32
  }
  func.func @transform_3(%arg0: i32) -> i32 {
    %c0_i32 = arith.constant 0 : i32
    %c0_i32_0 = arith.constant 0 : i32
    return %c0_i32 : i32
  }
  func.func @transform_4(%arg0: i32) -> (i32, i32, i32) {
    %c0_i32 = arith.constant 0 : i32
    %c0_i32_0 = arith.constant 0 : i32
    %c0_i32_1 = arith.constant 0 : i32
    return %arg0, %c0_i32, %c0_i32_0 : i32, i32, i32
  }
}

</mosaic_0001>

<bundles_post_ra>
// kernel: tpu_custom_call.1
= control target key start
LH: loop header
LB: loop body
LE: loop exit
PB: predicated region body
PF: predicated region fallthrough
CT: control target
= control target key end

     0   :  { %9 = vsyncpa [#allocation3], 0  ;;  %s2220_s0 = inlined_call_operand.hbm [shape: f32[8,4,16], index: 0, kind: input, shape index: {}]   ;;  %s2221_s1 = inlined_call_operand.hbm [shape: f32[8,16,16], index: 1, kind: input, shape index: {}]   ;;  %s2222_s2 = inlined_call_operand.vmem [shape: f32[16], index: 2, kind: input, shape index: {}]   ;;  %s2223_s3 = inlined_call_operand.vmem [shape: f32[4], index: 3, kind: input, shape index: {}]   ;;  %s2224_s4 = inlined_call_operand.hbm [shape: f32[8,4,16], index: 4, kind: output, shape index: {}]  }
   0x1   :  { %10 = vsyncpa [#allocation7], 0 }
   0x2   :  { %11 = vsyncpa [#allocation5], 0 }
   0x3   :  { %12 = vsyncpa [#allocation10], 0 }
   0x4   :  { %13 = vsyncpa [#allocation4], 0  ;;  %s1368_s15 = smov [#allocation2]   ;;  %s1268_s19 = scalar_lea.hbm %s2220_s0, 512 }
   0x5   :  { %s19_s16 = sshll.u32 %s1368_s15, 4  ;;  %p1269_p0 = scmp.ne.s32.totalorder %s2220_s0, %s1268_s19  ;;  %s20_s16 = int_to_ptr.vmem [resolvable:$true] %s19_s16 }
   0x6   :  { %p1272_p1 = scmp.lt.u32.totalorder %s1268_s19, %s2220_s0 }
   0x8   :  { %p1274_p2 = pnand %p1272_p1, %p1269_p0 }
   0xa   :  { %1277 = shalt.err (!%p1274_p2)
}
   0xb   :  { %s1278_s24 = scalar_lea.vmem %s20_s16, 512  ;;  %p1283_p4 = scmp.lt.s32.totalorder %s20_s16, %s20_s16 }
   0xc   :  { %p1279_p3 = scmp.ne.s32.totalorder %s20_s16, %s1278_s24  ;;  %p1284_p5 = scmp.lt.s32.totalorder %s1278_s24, %s1278_s24 }
   0xe   :  { %p1285_p6 = por %p1284_p5, %p1283_p4 }
  0x10   :  { %p1286_p7 = pnand %p1285_p6, %p1279_p3 }
  0x12   :  { %1289 = shalt.err (!%p1286_p7)
}
  0x13   :  { %s1369_s25 = smov 64   ;;  %s1370_s26 = smov 4  }
  0x14   :  { %25 = dma.hbm_to_vmem [thread:$0]  %s2220_s0, 512, %s20_s16, [#allocation3], %s1369_s25, %s1369_s25, %s1370_s26  }
  0x15   :  { %s1371_s29 = smov [#allocation6]   ;;  %s1290_s7 = scalar_lea.hbm %s2221_s1, 2048 }
  0x16   :  { %s31_s30 = sshll.u32 %s1371_s29, 4  ;;  %p1291_p8 = scmp.ne.s32.totalorder %s2221_s1, %s1290_s7  ;;  %s32_s30 = int_to_ptr.vmem [resolvable:$true] %s31_s30 }
  0x17   :  { %p1294_p9 = scmp.lt.u32.totalorder %s1290_s7, %s2221_s1 }
  0x19   :  { %p1296_p10 = pnand %p1294_p9, %p1291_p8 }
  0x1b   :  { %1299 = shalt.err (!%p1296_p10)
}
  0x1c   :  { %s1300_s12 = scalar_lea.vmem %s32_s30, 2048  ;;  %p1305_p12 = scmp.lt.s32.totalorder %s32_s30, %s32_s30 }
  0x1d   :  { %p1301_p11 = scmp.ne.s32.totalorder %s32_s30, %s1300_s12  ;;  %p1306_p13 = scmp.lt.s32.totalorder %s1300_s12, %s1300_s12 }
  0x1f   :  { %p1307_p0 = por %p1306_p13, %p1305_p12 }
  0x21   :  { %p1308_p1 = pnand %p1307_p0, %p1301_p11 }
  0x23   :  { %1311 = shalt.err (!%p1308_p1)
}
  0x24   :  { %s1372_s0 = smov 128   ;;  %s1373_s13 = smov 8  }
  0x25   :  { %37 = dma.hbm_to_vmem [thread:$0]  %s2221_s1, 2048, %s32_s30, [#allocation7], %s1372_s0, %s1372_s0, %s1373_s13  }
  0x26   :  { %s44_s18 = sshll.u32 %s2222_s2, 4  ;;  %s54_s21 = sshll.u32 %s2223_s3, 4  ;;  %s45_s18 = int_to_ptr.vmem [resolvable:$true] %s44_s18  ;;  %s55_s21 = int_to_ptr.vmem [resolvable:$true] %s54_s21 }
  0x27   :  { %s1312_s22 = scalar_lea.vmem %s45_s18, 16  ;;  %p1317_p3 = scmp.lt.s32.totalorder %s45_s18, %s45_s18 }
  0x28   :  { %p1313_p2 = scmp.ne.s32.totalorder %s45_s18, %s1312_s22  ;;  %p1318_p4 = scmp.lt.s32.totalorder %s1312_s22, %s1312_s22 }
  0x2a   :  { %p1319_p5 = por %p1318_p4, %p1317_p3 }
  0x2c   :  { %p1320_p6 = pnand %p1319_p5, %p1313_p2 }
  0x2e   :  { %1323 = shalt.err (!%p1320_p6)
}
  0x2f   :  { %s1374_s23 = smov [#allocation8]   ;;  %s1324_s1 = scalar_lea.vmem %s55_s21, 16 }
  0x30   :  { %47 = dma.vmem_to_smem %s45_s18, 16, %s1374_s23, [#allocation5]  }
  0x31   :  { %p1325_p7 = scmp.ne.s32.totalorder %s55_s21, %s1324_s1  ;;  %p1329_p8 = scmp.lt.s32.totalorder %s55_s21, %s55_s21 }
  0x32   :  { %p1330_p9 = scmp.lt.s32.totalorder %s1324_s1, %s1324_s1 }
  0x34   :  { %p1331_p10 = por %p1330_p9, %p1329_p8 }
  0x36   :  { %p1332_p11 = pnand %p1331_p10, %p1325_p7 }
  0x38   :  { %1335 = shalt.err (!%p1332_p11)
}
  0x39   :  { %s1375_s2 = smov [#allocation9]  }
  0x3a   :  { %57 = dma.vmem_to_smem %s55_s21, 16, %s1375_s2, [#allocation10]  }
  0x3b   :  { %1358 = dma.done.wait [#allocation3], 512  }
  0x3c   :  { %1359 = vsyncadd [#allocation3], 4294966784 }
  0x3d   :  { %1360 = dma.done.wait [#allocation7], 2048  }
  0x3e   :  { %1361 = vsyncadd [#allocation7], 4294965248 }
  0x3f   :  { %1362 = dma.done.wait [#allocation5], 16  }
  0x40   :  { %1363 = vsyncadd [#allocation5], 4294967280 }
  0x41   :  { %1364 = dma.done.wait [#allocation10], 16  }
  0x42   :  { %1365 = vsyncadd [#allocation10], 4294967280 }
  0x43   :  { %70 = sfence }
  0x44   :  { %v2225_v0 = vlaneseq  ;;  %s103_s3 = sld [smem:[#allocation8]]  ;;  %s1241_s24 = sld [smem:[#allocation8 + $0x1]]  ;;  %v1438_v2 = vld [vmem:[#allocation2 + $0x4] sm:$0x1]  ;;  %v1440_v3 = vld [vmem:[#allocation2 + $0x5] sm:$0x1] }
  0x45   :  { %s1242_s27 = sld [smem:[#allocation8 + $0x2]]  ;;  %s1243_s28 = sld [smem:[#allocation8 + $0x3]]  ;;  %2270 = vst [vmem:[#allocation18_spill] sm:$0xff] %v1438_v2  ;;  %2271 = vst [vmem:[#allocation19_spill] sm:$0xff] %v1440_v3  ;;  %v1442_v4 = vld [vmem:[#allocation2 + $0x6] sm:$0x1] }
  0x46   :  { %v1436_v1 = vshrl.u32 %v2225_v0, 7  ;;  %s167_s29 = sld [smem:[#allocation9]]  ;;  %v1444_v5 = vld [vmem:[#allocation2 + $0x7] sm:$0x1]  ;;  %v1449_v7 = vld [vmem:[#allocation2] sm:$0x1] }
  0x47   :  { %2272 = vst [vmem:[#allocation20_spill] sm:$0xff] %v1444_v5  ;;  %v1451_v8 = vld [vmem:[#allocation2 + $0x1] sm:$0x1]  ;;  %v1457_v11 = vld [vmem:[#allocation2 + $0x2] sm:$0x1]  ;;  %vm463_vm0 = vcmask 130048  }
  0x48   :  { %2269 = vst [vmem:[#allocation17_spill] sm:$0xff] %v1436_v1  ;;  %v1447_v6 = vsub.s32 0, %v1436_v1  ;;  %v1459_v12 = vld [vmem:[#allocation2 + $0x3] sm:$0x1]  ;;  %v1461_v13 = vld [vmem:[#allocation2 + $0x8] sm:$0x1] }
  0x49   :  { %2273 = vst [vmem:[#allocation21_spill] sm:$0xff] %v1459_v12  ;;  %v1471_v18 = vld [vmem:[#allocation2 + $0x9] sm:$0x1]  ;;  %v1473_v19 = vld [vmem:[#allocation2 + $0xa] sm:$0x1]  ;;  %s1576_s30 = sld [smem:[#allocation8 + $0x4]] }
  0x4a   :  { %v1453_v9 = vstv %s103_s3  ;;  %v1455_v10 = vstv %s1241_s24  ;;  %2274 = vst [vmem:[#allocation22_spill] sm:$0xff] %v1473_v19  ;;  %v1475_v20 = vld [vmem:[#allocation2 + $0xb] sm:$0x1]  ;;  %v1485_v25 = vld [vmem:[#allocation2 + $0xc] sm:$0x1]  ;;  %s1583_s5 = sld [smem:[#allocation8 + $0x5]] }
  0x4b   :  { %v106_v14 = vmul.f32 %v1453_v9, %v1438_v2  ;;  %v116_v15 = vmul.f32 %v1455_v10, %v1440_v3  ;;  %v1467_v16 = vstv %s1242_s27  ;;  %v1469_v17 = vstv %s1243_s28  ;;  %2275 = vst [vmem:[#allocation23_spill] sm:$0xff] %v1475_v20  ;;  %2276 = vst [vmem:[#allocation24_spill] sm:$0xff] %v1485_v25  ;;  %v1487_v26 = vld [vmem:[#allocation2 + $0xd] sm:$0x1]  ;;  %v1495_v31 = vld [vmem:[#allocation2 + $0xe] sm:$0x1] }
  0x4c   :  { %v134_v21 = vmul.f32 %v1467_v16, %v1442_v4  ;;  %v152_v22 = vmul.f32 %v1469_v17, %v1444_v5  ;;  %v1481_v23 = vstv %s167_s29  ;;  %v105_v24 = vmul.f32 %v1453_v9, %v1449_v7  ;;  %2277 = vst [vmem:[#allocation25_spill] sm:$0xff] %v1487_v26  ;;  %2278 = vst [vmem:[#allocation26_spill] sm:$0xff] %v1495_v31  ;;  %v1497_v32 = vld [vmem:[#allocation2 + $0xf] sm:$0x1]  ;;  %v1499_v33 = vld [vmem:[#allocation2 + $0x10] sm:$0x1] }
  0x4d   :  { %v124_v27 = vadd.f32 %v116_v15, %v106_v14  ;;  %v115_v28 = vmul.f32 %v1455_v10, %v1451_v8  ;;  %v133_v29 = vmul.f32 %v1467_v16, %v1457_v11  ;;  %v151_v30 = vmul.f32 %v1469_v17, %v1459_v12  ;;  %2279 = vst [vmem:[#allocation27_spill] sm:$0xff] %v1497_v32  ;;  %v1509_v38 = vld [vmem:[#allocation2 + $0x11] sm:$0x1]  ;;  %v1515_v43 = vld [vmem:[#allocation2 + $0x12] sm:$0x1]  ;;  %s1590_s6 = sld [smem:[#allocation8 + $0x6]] }
  0x4e   :  { %v107_v34 = vmul.f32 %v1453_v9, %v1461_v13  ;;  %v117_v35 = vmul.f32 %v1455_v10, %v1471_v18  ;;  %v135_v36 = vmul.f32 %v1467_v16, %v1473_v19  ;;  %v153_v37 = vmul.f32 %v1469_v17, %v1475_v20  ;;  %2280 = vst [vmem:[#allocation28_spill] sm:$0xff] %v1509_v38  ;;  %v1517_v44 = vld [vmem:[#allocation2 + $0x13] sm:$0x1]  ;;  %v1519_v45 = vld [vmem:[#allocation2 + $0x14] sm:$0x1]  ;;  %s1606_s7 = sld [smem:[#allocation8 + $0x7]] }
  0x4f   :  { %v142_v39 = vadd.f32 %v134_v21, %v124_v27  ;;  %v123_v40 = vadd.f32 %v115_v28, %v105_v24  ;;  %v108_v41 = vmul.f32 %v1453_v9, %v1485_v25  ;;  %v118_v42 = vmul.f32 %v1455_v10, %v1487_v26  ;;  %2281 = vst [vmem:[#allocation29_spill] sm:$0xff] %v1515_v43  ;;  %v1529_v54 = vld [vmem:[#allocation2 + $0x15] sm:$0x1]  ;;  %v1531_v55 = vld [vmem:[#allocation2 + $0x16] sm:$0x1]  ;;  %v1548_v24 = vld [vmem:[#allocation6 + $0x18] sm:$0xff] }
  0x50   :  { %v125_v46 = vadd.f32 %v117_v35, %v107_v34  ;;  %v136_v47 = vmul.f32 %v1467_v16, %v1495_v31  ;;  %v154_v48 = vmul.f32 %v1469_v17, %v1497_v32  ;;  %v109_v49 = vmul.f32 %v1453_v9, %v1499_v33  ;;  %v1533_v56 = vld [vmem:[#allocation2 + $0x17] sm:$0x1]  ;;  %v1542_v15 = vld [vmem:[#allocation2 + $0x18] sm:$0x1]  ;;  %v1544_v21 = vld [vmem:[#allocation2 + $0x19] sm:$0x1] }
  0x51   :  { %v160_v50 = vadd.f32 %v152_v22, %v142_v39  ;;  %v141_v51 = vadd.f32 %v133_v29, %v123_v40  ;;  %v126_v52 = vadd.f32 %v118_v42, %v108_v41  ;;  %v119_v53 = vmul.f32 %v1455_v10, %v1509_v38  ;;  %v1546_v22 = vld [vmem:[#allocation6 + $0x10] sm:$0xff]  ;;  %v1558_v40 = vld [vmem:[#allocation6] sm:$0xff]  ;;  %v1560_v41 = vld [vmem:[#allocation6 + $0x8] sm:$0xff]  ;;  %s1635_s8 = sld [smem:[#allocation9 + $0x1]]  ;;  %s1735_s9 = sld [smem:[#allocation8 + $0x8]] }
  0x52   :  { %v143_v57 = vadd.f32 %v135_v36, %v125_v46  ;;  %v137_v58 = vmul.f32 %v1467_v16, %v1515_v43  ;;  %v155_v59 = vmul.f32 %v1469_v17, %v1517_v44  ;;  %v110_v60 = vmul.f32 %v1453_v9, %v1519_v45  ;;  %2282 = vst [vmem:[#allocation30_spill] sm:$0xff] %v1546_v22  ;;  %s1737_s10 = sld [smem:[#allocation8 + $0x9]]  ;;  %s1746_s11 = sld [smem:[#allocation8 + $0xa]] }
  0x53   :  { %v170_v61 = vadd.f32 %v1481_v23, %v160_v50  ;;  %v159_v62 = vadd.f32 %v151_v30, %v141_v51  ;;  %v144_v63 = vadd.f32 %v136_v47, %v126_v52  ;;  %v127_v14 = vadd.f32 %v119_v53, %v109_v49  ;;  %v1570_v51 = vld [vmem:[#allocation6 + $0x28] sm:$0xff]  ;;  %s1755_s12 = sld [smem:[#allocation8 + $0xb]]  ;;  %s1788_s0 = sld [smem:[#allocation9 + $0x2]] }
  0x54   :  { %v161_v27 = vadd.f32 %v153_v37, %v143_v57  ;;  %v120_v28 = vmul.f32 %v1455_v10, %v1529_v54  ;;  %v138_v29 = vmul.f32 %v1467_v16, %v1531_v55  ;;  %v156_v30 = vmul.f32 %v1469_v17, %v1533_v56  ;;  %s1860_s13 = sld [smem:[#allocation8 + $0xc]]  ;;  %s1862_s14 = sld [smem:[#allocation8 + $0xd]] }
  0x55   :  { %v422_v34 = vrot.slane %v170_v61, %v1447_v6  ;;  %v169_v35 = vadd.f32 %v1481_v23, %v159_v62  ;;  %v162_v36 = vadd.f32 %v154_v48, %v144_v63  ;;  %v145_v39 = vadd.f32 %v137_v58, %v127_v14  ;;  %v1581_v14 = vld [vmem:[#allocation6 + $0x20] sm:$0xff]  ;;  %s1871_s15 = sld [smem:[#allocation8 + $0xe]]  ;;  %s1890_s16 = sld [smem:[#allocation8 + $0xf]] }
  0x56   :  { %v171_v37 = vadd.f32 %v1481_v23, %v161_v27  ;;  %v128_v42 = vadd.f32 %v120_v28, %v110_v60  ;;  %v111_v46 = vmul.f32 %v1453_v9, %v1542_v15  ;;  %v121_v47 = vmul.f32 %v1455_v10, %v1544_v21  ;;  %v1574_v60 = vld [vmem:[#allocation2 + $0x1a] sm:$0x1]  ;;  %2283 = vst [vmem:[#allocation31_spill] sm:$0xff] %v1581_v14  ;;  %s1924_s17 = sld [smem:[#allocation9 + $0x3]]  ;;  %s1376_s18 = smov [#allocation11]  }
  0x57   :  { %v449_v49 = vmul.f32 %v422_v34, %v1546_v22  ;;  %v418_v50 = vrot.slane %v169_v35, %v1447_v6  ;;  %v450_v48 = vmul.f32 %v422_v34, %v1548_v24  ;;  %v172_v52 = vadd.f32 %v1481_v23, %v162_v36  ;;  %v1588_v34 = vld [vmem:[#allocation2 + $0x1b] sm:$0x1]  ;;  %s1226_s19 = sshll.u32 %s1376_s18, 4  ;;  %s1227_s19 = int_to_ptr.vmem [resolvable:$true] %s1226_s19 }
  0x58   :  { %v426_v53 = vrot.slane %v171_v37, %v1447_v6  ;;  %v163_v57 = vadd.f32 %v155_v59, %v145_v39  ;;  %v146_v58 = vadd.f32 %v138_v29, %v128_v42  ;;  %v129_v27 = vadd.f32 %v121_v47, %v111_v46  ;;  %v1596_v42 = vld [vmem:[#allocation2 + $0x1c] sm:$0x1]  ;;  %v1598_v46 = vld [vmem:[#allocation2 + $0x1d] sm:$0x1]  ;;  %s1336_s20 = scalar_lea.vmem %s1227_s19, 512  ;;  %p1341_p13 = scmp.lt.s32.totalorder %s1227_s19, %s1227_s19 }
  0x59   :  { %v470_v61 = vsel %vm463_vm0, %v449_v49, 0.0  ;;  %v447_v62 = vmul.f32 %v418_v50, %v1558_v40  ;;  %v448_v63 = vmul.f32 %v418_v50, %v1560_v41  ;;  %v473_v28 = vsel %vm463_vm0, %v450_v48, 0.0  ;;  %v1602_v50 = vld [vmem:[#allocation6 + $0x38] sm:$0xff]  ;;  %v1604_v48 = vld [vmem:[#allocation6 + $0x30] sm:$0xff]  ;;  %p1337_p12 = scmp.ne.s32.totalorder %s1227_s19, %s1336_s20  ;;  %p1342_p0 = scmp.lt.s32.totalorder %s1336_s20, %s1336_s20 }
  0x5a   :  { %471 = vadd.xlane.f32.xlu1 %v470_v61  ;;  %v452_v59 = vmul.f32 %v426_v53, %v1570_v51  ;;  %v173_v29 = vadd.f32 %v1481_v23, %v163_v57  ;;  %v430_v36 = vrot.slane %v172_v52, %v1447_v6  ;;  %v164_v39 = vadd.f32 %v156_v30, %v146_v58  ;;  %v1612_v61 = vld [vmem:[#allocation2 + $0x1e] sm:$0x1] }
  0x5b   :  { %v464_v35 = vsel %vm463_vm0, %v447_v62, 0.0  ;;  %v139_v37 = vmul.f32 %v1467_v16, %v1574_v60  ;;  %v467_v47 = vsel %vm463_vm0, %v448_v63, 0.0  ;;  %v451_v49 = vmul.f32 %v426_v53, %v1581_v14  ;;  %2284 = vst [vmem:[#allocation32_spill] sm:$0xff] %v1602_v50  ;;  %2285 = vst [vmem:[#allocation33_spill] sm:$0xff] %v1604_v48  ;;  %v1614_v62 = vld [vmem:[#allocation2 + $0x1f] sm:$0x1]  ;;  %p1343_p1 = por %p1342_p0, %p1341_p13 }
  0x5c   :  { %465 = vadd.xlane.f32.xlu0 %v464_v35  ;;  %v434_v30 = vrot.slane %v173_v29, %v1447_v6  ;;  %v174_v52 = vadd.f32 %v1481_v23, %v164_v39  ;;  %v157_v58 = vmul.f32 %v1469_v17, %v1588_v34  ;;  %2286 = vst [vmem:[#allocation34_spill] sm:$0xff] %v1614_v62  ;;  %v479_v53 = vsel %vm463_vm0, %v452_v59, 0.0  ;;  %v1617_v63 = vld [vmem:[#allocation6 + $0x48] sm:$0xff]  ;;  %v1619_v35 = vld [vmem:[#allocation6 + $0x40] sm:$0xff] }
  0x5d   :  { %v147_v57 = vadd.f32 %v139_v37, %v129_v27  ;;  %2287 = vst [vmem:[#allocation35_spill] sm:$0xff] %v1617_v63  ;;  %2288 = vst [vmem:[#allocation36_spill] sm:$0xff] %v1619_v35  ;;  %v112_v29 = vmul.f32 %v1453_v9, %v1596_v42  ;;  %v122_v27 = vmul.f32 %v1455_v10, %v1598_v46  ;;  %v1633_v14 = vstv %s1576_s30  ;;  %p1344_p2 = pnand %p1343_p1, %p1337_p12 }
  0x5e   :  { %474 = vadd.xlane.f32.xlu1 %v473_v28  ;;  %v454_v39 = vmul.f32 %v430_v36, %v1602_v50  ;;  %v453_v37 = vmul.f32 %v430_v36, %v1604_v48  ;;  %v438_v0 = vrot.slane %v174_v52, %v1447_v6  ;;  %v140_v1 = vmul.f32 %v1467_v16, %v1612_v61 }
  0x5f   :  { %v165_v28 = vadd.f32 %v157_v58, %v147_v57  ;;  %v130_v59 = vadd.f32 %v122_v27, %v112_v29  ;;  %v158_v9 = vmul.f32 %v1469_v17, %v1614_v62  ;;  %v476_v10 = vsel %vm463_vm0, %v451_v49, 0.0 }
  0x60   :  { %468 = vadd.xlane.f32.xlu0 %v467_v47  ;;  %v456_v36 = vmul.f32 %v434_v30, %v1617_v63  ;;  %v455_v52 = vmul.f32 %v434_v30, %v1619_v35  ;;  %v1640_v47 = vld [vmem:[#allocation6 + $0x58] sm:$0xff]  ;;  %v179_v17 = vmul.f32 %v1633_v14, %v1449_v7  ;;  %v1646_v58 = vstv %s1583_s5  ;;  %v1656_v35 = vld [vmem:[#allocation6 + $0x50] sm:$0xff] }
  0x61   :  { %2289 = vst [vmem:[#allocation37_spill] sm:$0xff] %v1640_v47  ;;  %v175_v16 = vadd.f32 %v1481_v23, %v165_v28  ;;  %v148_v57 = vadd.f32 %v140_v1, %v130_v59  ;;  %v485_v29 = vsel %vm463_vm0, %v454_v39, 0.0  ;;  %v482_v49 = vsel %vm463_vm0, %v453_v37, 0.0  ;;  %2290 = vst [vmem:[#allocation38_spill] sm:$0xff] %v1656_v35 }
  0x62   :  { %480 = vadd.xlane.f32.xlu1 %v479_v53  ;;  %v189_v27 = vmul.f32 %v1646_v58, %v1451_v8  ;;  %v1653_v30 = vstv %s1590_s6  ;;  %v458_v53 = vmul.f32 %v438_v0, %v1640_v47  ;;  %v1661_v59 = vstv %s1606_s7 }
  0x63   :  { %v166_v1 = vadd.f32 %v158_v9, %v148_v57  ;;  %v207_v28 = vmul.f32 %v1653_v30, %v1457_v11  ;;  %v442_v39 = vrot.slane %v175_v16, %v1447_v6  ;;  %v225_v63 = vmul.f32 %v1661_v59, %v1459_v12  ;;  %v1670_v57 = vld [vmem:[#allocation6 + $0x68] sm:$0xff] }
  0x64   :  { %477 = vadd.xlane.f32.xlu0 %v476_v10  ;;  %v197_v37 = vadd.f32 %v189_v27, %v179_v17  ;;  %v180_v10 = vmul.f32 %v1633_v14, %v1438_v2  ;;  %v491_v47 = vsel %vm463_vm0, %v456_v36, 0.0  ;;  %v488_v9 = vsel %vm463_vm0, %v455_v52, 0.0  ;;  %2291 = vst [vmem:[#allocation39_spill] sm:$0xff] %v1670_v57 }
  0x65   :  { %v176_v48 = vadd.f32 %v1481_v23, %v166_v1  ;;  %v190_v16 = vmul.f32 %v1646_v58, %v1440_v3  ;;  %v457_v17 = vmul.f32 %v438_v0, %v1656_v35  ;;  %v208_v12 = vmul.f32 %v1653_v30, %v1442_v4  ;;  %v1687_v3 = vld [vmem:[#allocation6 + $0x60] sm:$0xff] }
  0x66   :  { %486 = vadd.xlane.f32.xlu1 %v485_v29  ;;  %v215_v27 = vadd.f32 %v207_v28, %v197_v37  ;;  %v181_v29 = vmul.f32 %v1633_v14, %v1461_v13  ;;  %v497_v36 = vsel %vm463_vm0, %v458_v53, 0.0  ;;  %v1682_v52 = vstv %s1635_s8 }
  0x67   :  { %v198_v2 = vadd.f32 %v190_v16, %v180_v10  ;;  %v226_v23 = vmul.f32 %v1661_v59, %v1444_v5  ;;  %v460_v1 = vmul.f32 %v442_v39, %v1670_v57  ;;  %v191_v28 = vmul.f32 %v1646_v58, %v1471_v18 }
  0x68   :  { %483 = vadd.xlane.f32.xlu0 %v482_v49  ;;  %v233_v0 = vadd.f32 %v225_v63, %v215_v27  ;;  %v209_v37 = vmul.f32 %v1653_v30, %v1473_v19  ;;  %v446_v49 = vrot.slane %v176_v48, %v1447_v6  ;;  %v227_v10 = vmul.f32 %v1661_v59, %v1475_v20 }
  0x69   :  { %v216_v53 = vadd.f32 %v208_v12, %v198_v2  ;;  %v182_v16 = vmul.f32 %v1633_v14, %v1485_v25  ;;  %v199_v35 = vadd.f32 %v191_v28, %v181_v29  ;;  %v192_v63 = vmul.f32 %v1646_v58, %v1487_v26  ;;  %v1705_v12 = vld [vmem:[#allocation6 + $0x78] sm:$0xff] }
  0x6a   :  { %492 = vadd.xlane.f32.xlu1 %v491_v47  ;;  %v243_v57 = vadd.f32 %v1682_v52, %v233_v0  ;;  %v210_v27 = vmul.f32 %v1653_v30, %v1495_v31  ;;  %v494_v47 = vsel %vm463_vm0, %v457_v17, 0.0  ;;  %v459_v2 = vmul.f32 %v442_v39, %v1687_v3  ;;  %2292 = vst [vmem:[#allocation40_spill] sm:$0xff] %v1705_v12  ;;  %v1712_v31 = vld [vmem:[#allocation6 + $0x70] sm:$0xff] }
  0x6b   :  { %v234_v48 = vadd.f32 %v226_v23, %v216_v53  ;;  %v217_v20 = vadd.f32 %v209_v37, %v199_v35  ;;  %v200_v19 = vadd.f32 %v192_v63, %v182_v16  ;;  %v228_v0 = vmul.f32 %v1661_v59, %v1497_v32 }
  0x6c   :  { %489 = vadd.xlane.f32.xlu0 %v488_v9  ;;  %v183_v29 = vmul.f32 %v1633_v14, %v1499_v33  ;;  %v503_v28 = vsel %vm463_vm0, %v460_v1, 0.0  ;;  %v193_v39 = vmul.f32 %v1646_v58, %v1509_v38  ;;  %v211_v35 = vmul.f32 %v1653_v30, %v1515_v43 }
  0x6d   :  { %v244_v9 = vadd.f32 %v1682_v52, %v234_v48  ;;  %v462_v17 = vmul.f32 %v446_v49, %v1705_v12  ;;  %v624_v23 = vrot.slane %v243_v57, %v1447_v6  ;;  %v235_v37 = vadd.f32 %v227_v10, %v217_v20 }
  0x6e   :  { %498 = vadd.xlane.f32.xlu1 %v497_v36  ;;  %v218_v53 = vadd.f32 %v210_v27, %v200_v19  ;;  %v500_v36 = vsel %vm463_vm0, %v459_v2, 0.0  ;;  %v201_v1 = vadd.f32 %v193_v39, %v183_v29  ;;  %v184_v16 = vmul.f32 %v1633_v14, %v1519_v45 }
  0x6f   :  { %v194_v63 = vmul.f32 %v1646_v58, %v1529_v54  ;;  %v461_v48 = vmul.f32 %v446_v49, %v1712_v31  ;;  %v628_v43 = vrot.slane %v244_v9, %v1447_v6  ;;  %v245_v12 = vadd.f32 %v1682_v52, %v235_v37 }
  0x70   :  { %495 = vadd.xlane.f32.xlu0 %v494_v47  ;;  %v236_v32 = vadd.f32 %v228_v0, %v218_v53  ;;  %v219_v20 = vadd.f32 %v211_v35, %v201_v1  ;;  %v229_v19 = vmul.f32 %v1661_v59, %v1517_v44  ;;  %v509_v10 = vsel %vm463_vm0, %v462_v17, 0.0 }
  0x71   :  { %v202_v57 = vadd.f32 %v194_v63, %v184_v16  ;;  %v654_v27 = vmul.f32 %v624_v23, %v1560_v41  ;;  %v212_v47 = vmul.f32 %v1653_v30, %v1531_v55  ;;  %v632_v49 = vrot.slane %v245_v12, %v1447_v6 }
  0x72   :  { %504 = vadd.xlane.f32.xlu1 %v503_v28  ;;  %v185_v2 = vmul.f32 %v1633_v14, %v1542_v15  ;;  %v506_v0 = vsel %vm463_vm0, %v461_v48, 0.0  ;;  %v653_v29 = vmul.f32 %v624_v23, %v1558_v40  ;;  %v656_v28 = vmul.f32 %v628_v43, %v1548_v24 }
  0x73   :  { %v246_v9 = vadd.f32 %v1682_v52, %v236_v32  ;;  %v237_v39 = vadd.f32 %v229_v19, %v219_v20  ;;  %v220_v35 = vadd.f32 %v212_v47, %v202_v57  ;;  %v230_v17 = vmul.f32 %v1661_v59, %v1533_v56 }
  0x74   :  { %501 = vadd.xlane.f32.xlu0 %v500_v36  ;;  %v195_v12 = vmul.f32 %v1646_v58, %v1544_v21  ;;  %v672_v37 = vsel %vm463_vm0, %v654_v27, 0.0  ;;  %v213_v23 = vmul.f32 %v1653_v30, %v1574_v60  ;;  %v655_v32 = vmul.f32 %v628_v43, %v1546_v22 }
  0x75   :  { %v658_v53 = vmul.f32 %v632_v49, %v1570_v51  ;;  %v186_v1 = vmul.f32 %v1633_v14, %v1596_v42  ;;  %v669_v16 = vsel %vm463_vm0, %v653_v29, 0.0  ;;  %v678_v63 = vsel %vm463_vm0, %v656_v28, 0.0  ;;  %v2293_v29 = vld [vmem:[#allocation31_spill] sm:$0xff] }
  0x76   :  { %510 = vadd.xlane.f32.xlu1 %v509_v10  ;;  %v203_v36 = vadd.f32 %v195_v12, %v185_v2  ;;  %v636_v48 = vrot.slane %v246_v9, %v1447_v6  ;;  %v196_v20 = vmul.f32 %v1646_v58, %v1598_v46  ;;  %v247_v43 = vadd.f32 %v1682_v52, %v237_v39 }
  0x77   :  { %v238_v19 = vadd.f32 %v230_v17, %v220_v35  ;;  %v231_v57 = vmul.f32 %v1661_v59, %v1588_v34  ;;  %v214_v14 = vmul.f32 %v1653_v30, %v1612_v61  ;;  %v1772_v47 = vstv %s1735_s9 }
  0x78   :  { %507 = vadd.xlane.f32.xlu0 %v506_v0  ;;  %v221_v10 = vadd.f32 %v213_v23, %v203_v36  ;;  %v204_v27 = vadd.f32 %v196_v20, %v186_v1  ;;  %v1775_v2 = vstv %s1737_s10  ;;  %v675_v58 = vsel %vm463_vm0, %v655_v32, 0.0  ;;  %v2294_v1 = vld [vmem:[#allocation33_spill] sm:$0xff] }
  0x79   :  { %v684_v0 = vsel %vm463_vm0, %v658_v53, 0.0  ;;  %v657_v28 = vmul.f32 %v632_v49, %v2293_v29  ;;  %v660_v9 = vmul.f32 %v636_v48, %v1602_v50  ;;  %v253_v39 = vmul.f32 %v1772_v47, %v1449_v7  ;;  %v2295_v20 = vld [vmem:[#allocation21_spill] sm:$0xff]  ;;  %v2296_v50 = vld [vmem:[#allocation18_spill] sm:$0xff] }
  0x7a   :  { %673 = vadd.xlane.f32.xlu1 %v672_v37  ;;  %v263_v30 = vmul.f32 %v1775_v2, %v1451_v8  ;;  %v1786_v35 = vstv %s1746_s11  ;;  %v640_v17 = vrot.slane %v247_v43, %v1447_v6  ;;  %v248_v12 = vadd.f32 %v1682_v52, %v238_v19 }
  0x7b   :  { %v232_v49 = vmul.f32 %v1661_v59, %v1614_v62  ;;  %v281_v37 = vmul.f32 %v1786_v35, %v1457_v11  ;;  %v239_v23 = vadd.f32 %v231_v57, %v221_v10  ;;  %v222_v32 = vadd.f32 %v214_v14, %v204_v27  ;;  %v2297_v62 = vld [vmem:[#allocation19_spill] sm:$0xff] }
  0x7c   :  { %670 = vadd.xlane.f32.xlu0 %v669_v16  ;;  %v271_v53 = vadd.f32 %v263_v30, %v253_v39  ;;  %v1797_v36 = vstv %s1755_s12  ;;  %v659_v16 = vmul.f32 %v636_v48, %v2294_v1  ;;  %v681_v43 = vsel %vm463_vm0, %v657_v28, 0.0  ;;  %v2298_v10 = vld [vmem:[#allocation35_spill] sm:$0xff] }
  0x7d   :  { %v254_v59 = vmul.f32 %v1772_v47, %v2296_v50  ;;  %v264_v57 = vmul.f32 %v1775_v2, %v2297_v62  ;;  %v690_v14 = vsel %vm463_vm0, %v660_v9, 0.0  ;;  %v662_v27 = vmul.f32 %v640_v17, %v2298_v10 }
  0x7e   :  { %679 = vadd.xlane.f32.xlu1 %v678_v63  ;;  %v299_v63 = vmul.f32 %v1797_v36, %v2295_v20  ;;  %v289_v19 = vadd.f32 %v281_v37, %v271_v53  ;;  %v644_v48 = vrot.slane %v248_v12, %v1447_v6  ;;  %v249_v28 = vadd.f32 %v1682_v52, %v239_v23 }
  0x7f   :  { %v240_v39 = vadd.f32 %v232_v49, %v222_v32  ;;  %v272_v30 = vadd.f32 %v264_v57, %v254_v59  ;;  %v255_v37 = vmul.f32 %v1772_v47, %v1461_v13  ;;  %v687_v53 = vsel %vm463_vm0, %v659_v16, 0.0  ;;  %v2300_v49 = vld [vmem:[#allocation22_spill] sm:$0xff] }
  0x80   :  { %676 = vadd.xlane.f32.xlu0 %v675_v58  ;;  %v282_v58 = vmul.f32 %v1786_v35, %v1442_v4  ;;  %v307_v9 = vadd.f32 %v299_v63, %v289_v19  ;;  %v265_v10 = vmul.f32 %v1775_v2, %v1471_v18  ;;  %v1820_v12 = vstv %s1788_s0 }
  0x81   :  { %v300_v23 = vmul.f32 %v1797_v36, %v1444_v5  ;;  %v283_v32 = vmul.f32 %v1786_v35, %v2300_v49  ;;  %v256_v16 = vmul.f32 %v1772_v47, %v1485_v25  ;;  %v696_v63 = vsel %vm463_vm0, %v662_v27, 0.0  ;;  %v2302_v49 = vld [vmem:[#allocation38_spill] sm:$0xff] }
  0x82   :  { %685 = vadd.xlane.f32.xlu1 %v684_v0  ;;  %v2299_v0 = vld [vmem:[#allocation36_spill] sm:$0xff]  ;;  %v290_v1 = vadd.f32 %v282_v58, %v272_v30  ;;  %v273_v59 = vadd.f32 %v265_v10, %v255_v37  ;;  %v648_v57 = vrot.slane %v249_v28, %v1447_v6  ;;  %v250_v58 = vadd.f32 %v1682_v52, %v240_v39  ;;  %v2303_v37 = vld [vmem:[#allocation23_spill] sm:$0xff]  ;;  %v2304_v27 = vld [vmem:[#allocation26_spill] sm:$0xff] }
  0x83   :  { %v661_v20 = vmul.f32 %v640_v17, %v2299_v0  ;;  %v266_v17 = vmul.f32 %v1775_v2, %v1487_v26  ;;  %v317_v10 = vadd.f32 %v1820_v12, %v307_v9  ;;  %v301_v25 = vmul.f32 %v1797_v36, %v2303_v37  ;;  %v2305_v28 = vld [vmem:[#allocation39_spill] sm:$0xff] }
  0x84   :  { %682 = vadd.xlane.f32.xlu0 %v681_v43  ;;  %v2301_v43 = vld [vmem:[#allocation37_spill] sm:$0xff]  ;;  %v308_v5 = vadd.f32 %v300_v23, %v290_v1  ;;  %v291_v26 = vadd.f32 %v283_v32, %v273_v59  ;;  %v257_v52 = vmul.f32 %v1772_v47, %v1499_v33  ;;  %v666_v39 = vmul.f32 %v648_v57, %v2305_v28 }
  0x85   :  { %v664_v19 = vmul.f32 %v644_v48, %v2301_v43  ;;  %v693_v30 = vsel %vm463_vm0, %v661_v20, 0.0  ;;  %v274_v0 = vadd.f32 %v266_v17, %v256_v16  ;;  %v284_v43 = vmul.f32 %v1786_v35, %v2304_v27  ;;  %v2306_v17 = vld [vmem:[#allocation27_spill] sm:$0xff] }
  0x86   :  { %691 = vadd.xlane.f32.xlu1 %v690_v14  ;;  %v663_v14 = vmul.f32 %v644_v48, %v2302_v49  ;;  %v267_v20 = vmul.f32 %v1775_v2, %v1509_v38  ;;  %v665_v9 = vmul.f32 %v648_v57, %v1687_v3  ;;  %v824_v23 = vrot.slane %v317_v10, %v1447_v6  ;;  %v2307_v38 = vld [vmem:[#allocation29_spill] sm:$0xff] }
  0x87   :  { %v702_v48 = vsel %vm463_vm0, %v664_v19, 0.0  ;;  %v318_v32 = vadd.f32 %v1820_v12, %v308_v5  ;;  %v309_v59 = vadd.f32 %v301_v25, %v291_v26  ;;  %v292_v16 = vadd.f32 %v284_v43, %v274_v0  ;;  %v2308_v25 = vld [vmem:[#allocation40_spill] sm:$0xff] }
  0x88   :  { %688 = vadd.xlane.f32.xlu0 %v687_v53  ;;  %v652_v53 = vrot.slane %v250_v58, %v1447_v6  ;;  %v699_v1 = vsel %vm463_vm0, %v663_v14, 0.0  ;;  %v275_v19 = vadd.f32 %v267_v20, %v257_v52  ;;  %v285_v28 = vmul.f32 %v1786_v35, %v2307_v38 }
  0x89   :  { %v258_v58 = vmul.f32 %v1772_v47, %v1519_v45  ;;  %v268_v57 = vmul.f32 %v1775_v2, %v1529_v54  ;;  %v708_v5 = vsel %vm463_vm0, %v666_v39, 0.0  ;;  %v854_v43 = vmul.f32 %v824_v23, %v1560_v41 }
  0x8a   :  { %697 = vadd.xlane.f32.xlu1 %v696_v63  ;;  %v302_v63 = vmul.f32 %v1797_v36, %v2306_v17  ;;  %v668_v26 = vmul.f32 %v652_v53, %v2308_v25  ;;  %v667_v0 = vmul.f32 %v652_v53, %v1712_v31  ;;  %v828_v14 = vrot.slane %v318_v32, %v1447_v6 }
  0x8b   :  { %v319_v10 = vadd.f32 %v1820_v12, %v309_v59  ;;  %v293_v20 = vadd.f32 %v285_v28, %v275_v19  ;;  %v276_v39 = vadd.f32 %v268_v57, %v258_v58  ;;  %v286_v53 = vmul.f32 %v1786_v35, %v1531_v55 }
  0x8c   :  { %694 = vadd.xlane.f32.xlu0 %v693_v30  ;;  %v705_v30 = vsel %vm463_vm0, %v665_v9, 0.0  ;;  %v310_v52 = vadd.f32 %v302_v63, %v292_v16  ;;  %v259_v9 = vmul.f32 %v1772_v47, %v1542_v15  ;;  %v269_v32 = vmul.f32 %v1775_v2, %v1544_v21 }
  0x8d   :  { %v711_v28 = vsel %vm463_vm0, %v667_v0, 0.0  ;;  %v872_v59 = vsel %vm463_vm0, %v854_v43, 0.0  ;;  %v853_v16 = vmul.f32 %v824_v23, %v1558_v40  ;;  %v856_v63 = vmul.f32 %v828_v14, %v1548_v24 }
  0x8e   :  { %703 = vadd.xlane.f32.xlu1 %v702_v48  ;;  %v303_v48 = vmul.f32 %v1797_v36, %v1517_v44  ;;  %v832_v19 = vrot.slane %v319_v10, %v1447_v6  ;;  %v320_v58 = vadd.f32 %v1820_v12, %v310_v52  ;;  %v304_v57 = vmul.f32 %v1797_v36, %v1533_v56 }
  0x8f   :  { %v1893_v0 = vstv %s1860_s13  ;;  %v1896_v43 = vstv %s1862_s14  ;;  %v277_v23 = vadd.f32 %v269_v32, %v259_v9  ;;  %v260_v10 = vmul.f32 %v1772_v47, %v1596_v42 }
  0x90   :  { %700 = vadd.xlane.f32.xlu0 %v699_v1  ;;  %v714_v1 = vsel %vm463_vm0, %v668_v26, 0.0  ;;  %v294_v26 = vadd.f32 %v286_v53, %v276_v39  ;;  %v270_v52 = vmul.f32 %v1775_v2, %v1598_v46  ;;  %v878_v39 = vsel %vm463_vm0, %v856_v63, 0.0 }
  0x91   :  { %v855_v53 = vmul.f32 %v828_v14, %v1546_v22  ;;  %v1912_v9 = vstv %s1871_s15  ;;  %v858_v47 = vmul.f32 %v832_v19, %v1570_v51  ;;  %v836_v2 = vrot.slane %v320_v58, %v1447_v6 }
  0x92   :  { %709 = vadd.xlane.f32.xlu1 %v708_v5  ;;  %v311_v5 = vadd.f32 %v303_v48, %v293_v20  ;;  %v337_v20 = vmul.f32 %v1896_v43, %v1451_v8  ;;  %v869_v48 = vsel %vm463_vm0, %v853_v16, 0.0  ;;  %v312_v8 = vadd.f32 %v304_v57, %v294_v26 }
  0x93   :  { %v278_v16 = vadd.f32 %v270_v52, %v260_v10  ;;  %v288_v63 = vmul.f32 %v1786_v35, %v1612_v61  ;;  %v857_v14 = vmul.f32 %v832_v19, %v2293_v29  ;;  %v875_v58 = vsel %vm463_vm0, %v855_v53, 0.0  ;;  %v2309_v19 = vld [vmem:[#allocation32_spill] sm:$0xff] }
  0x94   :  { %706 = vadd.xlane.f32.xlu0 %v705_v30  ;;  %v287_v30 = vmul.f32 %v1786_v35, %v1574_v60  ;;  %v321_v32 = vadd.f32 %v1820_v12, %v311_v5  ;;  %v1928_v5 = vstv %s1890_s16  ;;  %v328_v57 = vmul.f32 %v1893_v0, %v2296_v50 }
  0x95   :  { %v338_v26 = vmul.f32 %v1896_v43, %v2297_v62  ;;  %v884_v35 = vsel %vm463_vm0, %v858_v47, 0.0  ;;  %v296_v52 = vadd.f32 %v288_v63, %v278_v16  ;;  %v881_v50 = vsel %vm463_vm0, %v857_v14, 0.0 }
  0x96   :  { %715 = vadd.xlane.f32.xlu1 %v714_v1  ;;  %v327_v1 = vmul.f32 %v1893_v0, %v1449_v7  ;;  %v305_v7 = vmul.f32 %v1797_v36, %v1588_v34  ;;  %vm539_vm1 = vcmask 130112   ;;  %vm612_vm2 = vcmask 122880  }
  0x98   :  { %712 = vadd.xlane.f32.xlu0 %v711_v28  ;;  %v295_v28 = vadd.f32 %v287_v30, %v277_v23  ;;  %v345_v22 = vadd.f32 %v337_v20, %v327_v1  ;;  %v860_v23 = vmul.f32 %v836_v2, %v2309_v19  ;;  %v840_v30 = vrot.slane %v321_v32, %v1447_v6  ;;  %v2310_v1 = vld [vmem:[#allocation34_spill] sm:$0xff] }
  0x99   :  { %v306_v20 = vmul.f32 %v1797_v36, %v2310_v1  ;;  %v346_v19 = vadd.f32 %v338_v26, %v328_v57  ;;  %v356_v32 = vmul.f32 %v1912_v9, %v1442_v4  ;;  %v339_v36 = vmul.f32 %v1896_v43, %v1471_v18  ;;  %v2314_v4 = vld [vmem:[#allocation36_spill] sm:$0xff] }
  0x9a   :  { %873 = vadd.xlane.f32.xlu1 %v872_v59  ;;  %v355_v59 = vmul.f32 %v1912_v9, %v1457_v11  ;;  %v322_v11 = vadd.f32 %v1820_v12, %v312_v8  ;;  %v313_v10 = vadd.f32 %v305_v7, %v295_v28  ;;  %v329_v7 = vmul.f32 %v1893_v0, %v1461_v13  ;;  %v2313_v28 = vld [vmem:[#allocation35_spill] sm:$0xff]  ;;  %v2315_v18 = vld [vmem:[#allocation20_spill] sm:$0xff] }
  0x9b   :  { %v890_v8 = vsel %vm463_vm0, %v860_v23, 0.0  ;;  %v314_v63 = vadd.f32 %v306_v20, %v296_v52  ;;  %v1957_v13 = vstv %s1924_s17  ;;  %v364_v57 = vadd.f32 %v356_v32, %v346_v19  ;;  %v2316_v23 = vld [vmem:[#allocation22_spill] sm:$0xff]  ;;  %v2318_v52 = vld [vmem:[#allocation25_spill] sm:$0xff] }
  0x9c   :  { %870 = vadd.xlane.f32.xlu0 %v869_v48  ;;  %v2311_v48 = vld [vmem:[#allocation33_spill] sm:$0xff]  ;;  %v363_v62 = vadd.f32 %v355_v59, %v345_v22  ;;  %v844_v22 = vrot.slane %v322_v11, %v1447_v6  ;;  %v323_v16 = vadd.f32 %v1820_v12, %v313_v10  ;;  %v861_v59 = vmul.f32 %v840_v30, %v2314_v4  ;;  %v2317_v11 = vld [vmem:[#allocation24_spill] sm:$0xff] }
  0x9d   :  { %v859_v53 = vmul.f32 %v836_v2, %v2311_v48  ;;  %v862_v2 = vmul.f32 %v840_v30, %v2313_v28  ;;  %v374_v26 = vmul.f32 %v1928_v5, %v2315_v18  ;;  %v330_v10 = vmul.f32 %v1893_v0, %v2317_v11 }
  0x9e   :  { %879 = vadd.xlane.f32.xlu1 %v878_v39  ;;  %v2312_v39 = vld [vmem:[#allocation21_spill] sm:$0xff]  ;;  %v340_v20 = vmul.f32 %v1896_v43, %v2318_v52  ;;  %v848_v19 = vrot.slane %v323_v16, %v1447_v6  ;;  %v375_v18 = vmul.f32 %v1928_v5, %v2303_v37  ;;  %v2320_v16 = vld [vmem:[#allocation28_spill] sm:$0xff]  ;;  %v332_v52 = vmul.f32 %v1893_v0, %v1519_v45 }
  0x9f   :  { %v373_v47 = vmul.f32 %v1928_v5, %v2312_v39  ;;  %v887_v14 = vsel %vm463_vm0, %v859_v53, 0.0  ;;  %v357_v39 = vmul.f32 %v1912_v9, %v2316_v23  ;;  %v896_v30 = vsel %vm463_vm0, %v862_v2, 0.0 }
  0xa0   :  { %876 = vadd.xlane.f32.xlu0 %v875_v58  ;;  %v348_v2 = vadd.f32 %v340_v20, %v330_v10  ;;  %v358_v23 = vmul.f32 %v1912_v9, %v2304_v27  ;;  %v342_v20 = vmul.f32 %v1896_v43, %v1529_v54  ;;  %v377_v45 = vmul.f32 %v1928_v5, %v1517_v44 }
  0xa1   :  { %v381_v58 = vadd.f32 %v373_v47, %v363_v62  ;;  %v324_v62 = vadd.f32 %v1820_v12, %v314_v63  ;;  %v863_v47 = vmul.f32 %v844_v22, %v2302_v49  ;;  %v331_v12 = vmul.f32 %v1893_v0, %v1499_v33 }
  0xa2   :  { %885 = vadd.xlane.f32.xlu1 %v884_v35  ;;  %v347_v35 = vadd.f32 %v339_v36, %v329_v7  ;;  %v893_v7 = vsel %vm463_vm0, %v861_v59, 0.0  ;;  %v382_v36 = vadd.f32 %v374_v26, %v364_v57  ;;  %v865_v57 = vmul.f32 %v848_v19, %v1687_v3 }
  0xa3   :  { %v391_v32 = vadd.f32 %v1957_v13, %v381_v58  ;;  %v852_v58 = vrot.slane %v324_v62, %v1447_v6  ;;  %v899_v37 = vsel %vm463_vm0, %v863_v47, 0.0  ;;  %v376_v33 = vmul.f32 %v1928_v5, %v2306_v17 }
  0xa4   :  { %882 = vadd.xlane.f32.xlu0 %v881_v50  ;;  %v2319_v50 = vld [vmem:[#allocation37_spill] sm:$0xff]  ;;  %v392_v27 = vadd.f32 %v1957_v13, %v382_v36  ;;  %v366_v11 = vadd.f32 %v358_v23, %v348_v2  ;;  %v360_v36 = vmul.f32 %v1912_v9, %v1531_v55 }
  0xa5   :  { %v864_v53 = vmul.f32 %v844_v22, %v2319_v50  ;;  %v341_v22 = vmul.f32 %v1896_v43, %v2320_v16  ;;  %v1024_v26 = vrot.slane %v391_v32, %v1447_v6  ;;  %v867_v17 = vmul.f32 %v852_v58, %v1712_v31 }
  0xa6   :  { %891 = vadd.xlane.f32.xlu1 %v890_v8  ;;  %v365_v8 = vadd.f32 %v357_v39, %v347_v35  ;;  %v359_v39 = vmul.f32 %v1912_v9, %v2307_v38  ;;  %v1028_v62 = vrot.slane %v392_v27, %v1447_v6  ;;  %v384_v54 = vadd.f32 %v376_v33, %v366_v11  ;;  %v2323_v11 = vld [vmem:[#allocation32_spill] sm:$0xff] }
  0xa7   :  { %v902_v63 = vsel %vm463_vm0, %v864_v53, 0.0  ;;  %v349_v10 = vadd.f32 %v341_v22, %v331_v12  ;;  %v868_v53 = vmul.f32 %v852_v58, %v2308_v25  ;;  %v1054_v38 = vmul.f32 %v1024_v26, %v1560_v41 }
  0xa8   :  { %888 = vadd.xlane.f32.xlu0 %v887_v14  ;;  %v2321_v14 = vld [vmem:[#allocation39_spill] sm:$0xff]  ;;  %v383_v35 = vadd.f32 %v375_v18, %v365_v8  ;;  %v333_v18 = vmul.f32 %v1893_v0, %v1542_v15  ;;  %v343_v41 = vmul.f32 %v1896_v43, %v1544_v21  ;;  %v911_v2 = vsel %vm463_vm0, %v867_v17, 0.0 }
  0xa9   :  { %v866_v59 = vmul.f32 %v848_v19, %v2321_v14  ;;  %v905_v19 = vsel %vm463_vm0, %v865_v57, 0.0  ;;  %v367_v32 = vadd.f32 %v359_v39, %v349_v10  ;;  %v914_v8 = vsel %vm463_vm0, %v868_v53, 0.0  ;;  %v2322_v57 = vld [vmem:[#allocation30_spill] sm:$0xff] }
  0xaa   :  { %897 = vadd.xlane.f32.xlu1 %v896_v30  ;;  %v393_v47 = vadd.f32 %v1957_v13, %v383_v35  ;;  %v1072_v44 = vsel %vm463_vm0, %v1054_v38, 0.0  ;;  %v1053_v23 = vmul.f32 %v1024_v26, %v1558_v40  ;;  %v1056_v12 = vmul.f32 %v1028_v62, %v1548_v24 }
  0xab   :  { %v908_v30 = vsel %vm463_vm0, %v866_v59, 0.0  ;;  %v394_v55 = vadd.f32 %v1957_v13, %v384_v54  ;;  %v385_v22 = vadd.f32 %v377_v45, %v367_v32  ;;  %v378_v15 = vmul.f32 %v1928_v5, %v1533_v56 }
  0xac   :  { %894 = vadd.xlane.f32.xlu0 %v893_v7  ;;  %v350_v7 = vadd.f32 %v342_v20, %v332_v52  ;;  %v1032_v16 = vrot.slane %v393_v47, %v1447_v6  ;;  %v351_v21 = vadd.f32 %v343_v41, %v333_v18  ;;  %v361_v59 = vmul.f32 %v1912_v9, %v1574_v60 }
  0xad   :  { %v334_v58 = vmul.f32 %v1893_v0, %v1596_v42  ;;  %v344_v24 = vmul.f32 %v1896_v43, %v1598_v46  ;;  %v1069_v40 = vsel %vm463_vm0, %v1053_v23, 0.0  ;;  %v1055_v26 = vmul.f32 %v1028_v62, %v2322_v57 }
  0xae   :  { %903 = vadd.xlane.f32.xlu1 %v902_v63  ;;  %v368_v63 = vadd.f32 %v360_v36, %v350_v7  ;;  %v1058_v56 = vmul.f32 %v1032_v16, %v1570_v51  ;;  %v1036_v27 = vrot.slane %v394_v55, %v1447_v6  ;;  %v395_v60 = vadd.f32 %v1957_v13, %v385_v22 }
  0xaf   :  { %v379_v42 = vmul.f32 %v1928_v5, %v1588_v34  ;;  %v369_v35 = vadd.f32 %v361_v59, %v351_v21  ;;  %v352_v46 = vadd.f32 %v344_v24, %v334_v58  ;;  %v362_v43 = vmul.f32 %v1912_v9, %v1612_v61 }
  0xb0   :  { %900 = vadd.xlane.f32.xlu0 %v899_v37  ;;  %v1078_v37 = vsel %vm463_vm0, %v1056_v12, 0.0  ;;  %v386_v0 = vadd.f32 %v378_v15, %v368_v63  ;;  %v1075_v33 = vsel %vm463_vm0, %v1055_v26, 0.0  ;;  %v1057_v39 = vmul.f32 %v1032_v16, %v2293_v29  ;;  %v2325_v12 = vld [vmem:[#allocation17_spill] sm:$0xff] }
  0xb1   :  { %v1084_v51 = vsel %vm463_vm0, %v1058_v56, 0.0  ;;  %v1060_v10 = vmul.f32 %v1036_v27, %v2323_v11  ;;  %v1040_v52 = vrot.slane %v395_v60, %v1447_v6  ;;  %v387_v20 = vadd.f32 %v379_v42, %v369_v35 }
  0xb2   :  { %909 = vadd.xlane.f32.xlu1 %v908_v30  ;;  %v396_v34 = vadd.f32 %v1957_v13, %v386_v0  ;;  %v370_v30 = vadd.f32 %v362_v43, %v352_v46  ;;  %v380_v53 = vmul.f32 %v1928_v5, %v2310_v1  ;;  %v1081_v61 = vsel %vm463_vm0, %v1057_v39, 0.0 }
  0xb3   :  { %v1059_v9 = vmul.f32 %v1036_v27, %v2311_v48  ;;  %v1090_v29 = vsel %vm463_vm0, %v1060_v10, 0.0  ;;  %v397_v38 = vadd.f32 %v1957_v13, %v387_v20  ;;  %v1061_v5 = vmul.f32 %v1040_v52, %v2314_v4 }
  0xb4   :  { %906 = vadd.xlane.f32.xlu0 %v905_v19  ;;  %v1062_v19 = vmul.f32 %v1040_v52, %v2313_v28  ;;  %v1044_v17 = vrot.slane %v396_v34, %v1447_v6  ;;  %v388_v62 = vadd.f32 %v380_v53, %v370_v30 }
  0xb5   :  { %v1087_v47 = vsel %vm463_vm0, %v1059_v9, 0.0  ;;  %v1048_v45 = vrot.slane %v397_v38, %v1447_v6  ;;  %v1093_v28 = vsel %vm463_vm0, %v1061_v5, 0.0 }
  0xb6   :  { %915 = vadd.xlane.f32.xlu1 %v914_v8  ;;  %v1096_v1 = vsel %vm463_vm0, %v1062_v19, 0.0  ;;  %v1064_v48 = vmul.f32 %v1044_v17, %v2319_v50  ;;  %v398_v54 = vadd.f32 %v1957_v13, %v388_v62  ;;  %v1063_v32 = vmul.f32 %v1044_v17, %v2302_v49 }
  0xb7   :  { %v1066_v36 = vmul.f32 %v1048_v45, %v2321_v14  ;;  %v1065_v50 = vmul.f32 %v1048_v45, %v1687_v3 }
  0xb8   :  { %912 = vadd.xlane.f32.xlu0 %v911_v2  ;;  %v1102_v7 = vsel %vm463_vm0, %v1064_v48, 0.0  ;;  %v1052_v4 = vrot.slane %v398_v54, %v1447_v6  ;;  %v1099_v8 = vsel %vm463_vm0, %v1063_v32, 0.0  ;;  %v2324_v2 = vlaneseq }
  0xb9   :  { %v1108_v13 = vsel %vm463_vm0, %v1066_v36, 0.0  ;;  %v1105_v49 = vsel %vm463_vm0, %v1065_v50, 0.0 }
  0xba   :  { %1073 = vadd.xlane.f32.xlu1 %v1072_v44  ;;  %v1068_v18 = vmul.f32 %v1052_v4, %v2308_v25  ;;  %v1067_v41 = vmul.f32 %v1052_v4, %v1712_v31  ;;  %v529_v3 = vand.u32 127, %v2324_v2 }
  0xbc   :  { %1070 = vadd.xlane.f32.xlu0 %v1069_v40  ;;  %v1114_v14 = vsel %vm463_vm0, %v1068_v18, 0.0  ;;  %v1111_v6 = vsel %vm463_vm0, %v1067_v41, 0.0  ;;  %v534_v44 = vadd.s32 4294967288, %v529_v3  ;;  %v2072_v16 = vsub.s32 %v529_v3, %v2325_v12 }
  0xbe   :  { %1079 = vadd.xlane.f32.xlu1 %v1078_v37  ;;  %v2075_v25 = vsub.s32 %v534_v44, %v2325_v12 }
  0xc0   :  { %1076 = vadd.xlane.f32.xlu0 %v1075_v33 }
  0xc2   :  { %1085 = vadd.xlane.f32.xlu1 %v1084_v51 }
  0xc4   :  { %1082 = vadd.xlane.f32.xlu0 %v1081_v61 }
  0xc6   :  { %1091 = vadd.xlane.f32.xlu1 %v1090_v29 }
  0xc8   :  { %1088 = vadd.xlane.f32.xlu0 %v1087_v47 }
  0xca   :  { %1097 = vadd.xlane.f32.xlu1 %v1096_v1 }
  0xcc   :  { %1094 = vadd.xlane.f32.xlu0 %v1093_v28 }
  0xce   :  { %1103 = vadd.xlane.f32.xlu1 %v1102_v7 }
  0xd0   :  { %1100 = vadd.xlane.f32.xlu0 %v1099_v8 }
  0xd2   :  { %1109 = vadd.xlane.f32.xlu1 %v1108_v13 }
  0xd4   :  { %1106 = vadd.xlane.f32.xlu0 %v1105_v49 }
  0xd6   :  { %1115 = vadd.xlane.f32.xlu1 %v1114_v14 }
  0xd8   :  { %1112 = vadd.xlane.f32.xlu0 %v1111_v6 }
  0xe7   :  { %v472_v23 = vpop.xlane.xlu1 %471 }
  0xe8   :  { %v544_v22 = vrot.slane %v472_v23, %v2072_v16 }
  0xe9   :  { %v466_v55 = vpop.xlane.xlu0 %465 }
  0xea   :  { %v533_v21 = vrot.slane %v466_v55, %v2072_v16 }
  0xeb   :  { %v475_v31 = vpop.xlane.xlu1 %474 }
  0xec   :  { %v548_v63 = vrot.slane %v475_v31, %v2075_v25 }
  0xed   :  { %v469_v15 = vpop.xlane.xlu0 %468 }
  0xee   :  { %v549_v59 = vsel %vm539_vm1, %v548_v63, %v544_v22  ;;  %v538_v58 = vrot.slane %v469_v15, %v2075_v25 }
  0xef   :  { %614 = vst.msk [vmem:[#allocation11 + $0x4] sm:$0x1] %vm612_vm2, %v549_v59  ;;  %v481_v24 = vpop.xlane.xlu1 %480 }
  0xf0   :  { %v540_v40 = vsel %vm539_vm1, %v538_v58, %v533_v21  ;;  %v557_v37 = vrot.slane %v481_v24, %v2075_v25 }
  0xf1   :  { %613 = vst.msk [vmem:[#allocation11] sm:$0x1] %vm612_vm2, %v540_v40  ;;  %v478_v57 = vpop.xlane.xlu0 %477 }
  0xf2   :  { %v553_v26 = vrot.slane %v478_v57, %v2072_v16 }
  0xf3   :  { %v487_v56 = vpop.xlane.xlu1 %486 }
  0xf4   :  { %v558_v27 = vsel %vm539_vm1, %v557_v37, %v553_v26  ;;  %v566_v60 = vrot.slane %v487_v56, %v2075_v25 }
  0xf5   :  { %615 = vst.msk [vmem:[#allocation11 + $0x8] sm:$0x1] %vm612_vm2, %v558_v27  ;;  %v484_v42 = vpop.xlane.xlu0 %483 }
  0xf6   :  { %v562_v0 = vrot.slane %v484_v42, %v2072_v16 }
  0xf7   :  { %v493_v35 = vpop.xlane.xlu1 %492 }
  0xf8   :  { %v567_v46 = vsel %vm539_vm1, %v566_v60, %v562_v0  ;;  %v575_v43 = vrot.slane %v493_v35, %v2075_v25 }
  0xf9   :  { %616 = vst.msk [vmem:[#allocation11 + $0xc] sm:$0x1] %vm612_vm2, %v567_v46  ;;  %v490_v33 = vpop.xlane.xlu0 %489 }
  0xfa   :  { %v571_v39 = vrot.slane %v490_v33, %v2072_v16 }
  0xfb   :  { %v499_v51 = vpop.xlane.xlu1 %498 }
  0xfc   :  { %v576_v11 = vsel %vm539_vm1, %v575_v43, %v571_v39  ;;  %v584_v10 = vrot.slane %v499_v51, %v2075_v25 }
  0xfd   :  { %617 = vst.msk [vmem:[#allocation11 + $0x10] sm:$0x1] %vm612_vm2, %v576_v11  ;;  %v496_v52 = vpop.xlane.xlu0 %495 }
  0xfe   :  { %v580_v34 = vrot.slane %v496_v52, %v2072_v16 }
  0xff   :  { %v505_v20 = vpop.xlane.xlu1 %504 }
 0x100   :  { %v585_v30 = vsel %vm539_vm1, %v584_v10, %v580_v34  ;;  %v593_v53 = vrot.slane %v505_v20, %v2075_v25 }
 0x101   :  { %618 = vst.msk [vmem:[#allocation11 + $0x14] sm:$0x1] %vm612_vm2, %v585_v30  ;;  %v502_v61 = vpop.xlane.xlu0 %501 }
 0x102   :  { %v589_v9 = vrot.slane %v502_v61, %v2072_v16 }
 0x103   :  { %v511_v29 = vpop.xlane.xlu1 %510 }
 0x104   :  { %v594_v19 = vsel %vm539_vm1, %v593_v53, %v589_v9  ;;  %v602_v17 = vrot.slane %v511_v29, %v2075_v25 }
 0x105   :  { %619 = vst.msk [vmem:[#allocation11 + $0x18] sm:$0x1] %vm612_vm2, %v594_v19  ;;  %v508_v38 = vpop.xlane.xlu0 %507 }
 0x106   :  { %v598_v62 = vrot.slane %v508_v38, %v2072_v16 }
 0x107   :  { %v674_v47 = vpop.xlane.xlu1 %673 }
 0x108   :  { %v603_v5 = vsel %vm539_vm1, %v602_v17, %v598_v62  ;;  %v740_v1 = vrot.slane %v674_v47, %v2075_v25 }
 0x109   :  { %620 = vst.msk [vmem:[#allocation11 + $0x1c] sm:$0x1] %vm612_vm2, %v603_v5  ;;  %v671_v48 = vpop.xlane.xlu0 %670 }
 0x10a   :  { %v736_v45 = vrot.slane %v671_v48, %v2072_v16 }
 0x10b   :  { %v680_v54 = vpop.xlane.xlu1 %679 }
 0x10c   :  { %v741_v28 = vsel %vm539_vm1, %v740_v1, %v736_v45  ;;  %v749_v32 = vrot.slane %v680_v54, %v2075_v25 }
 0x10d   :  { %813 = vst.msk [vmem:[#allocation11 + $0x1] sm:$0x1] %vm612_vm2, %v741_v28  ;;  %v677_v7 = vpop.xlane.xlu0 %676 }
 0x10e   :  { %v745_v36 = vrot.slane %v677_v7, %v2072_v16 }
 0x10f   :  { %v686_v4 = vpop.xlane.xlu1 %685 }
 0x110   :  { %v750_v8 = vsel %vm539_vm1, %v749_v32, %v745_v36  ;;  %v758_v50 = vrot.slane %v686_v4, %v2075_v25 }
 0x111   :  { %814 = vst.msk [vmem:[#allocation11 + $0x5] sm:$0x1] %vm612_vm2, %v750_v8  ;;  %v683_v13 = vpop.xlane.xlu0 %682 }
 0x112   :  { %v754_v18 = vrot.slane %v683_v13, %v2072_v16 }
 0x113   :  { %v692_v49 = vpop.xlane.xlu1 %691 }
 0x114   :  { %v759_v41 = vsel %vm539_vm1, %v758_v50, %v754_v18  ;;  %v767_v14 = vrot.slane %v692_v49, %v2075_v25 }
 0x115   :  { %815 = vst.msk [vmem:[#allocation11 + $0x9] sm:$0x1] %vm612_vm2, %v759_v41  ;;  %v689_v6 = vpop.xlane.xlu0 %688 }
 0x116   :  { %v763_v2 = vrot.slane %v689_v6, %v2072_v16 }
 0x117   :  { %v698_v3 = vpop.xlane.xlu1 %697 }
 0x118   :  { %v768_v44 = vsel %vm539_vm1, %v767_v14, %v763_v2  ;;  %v776_v23 = vrot.slane %v698_v3, %v2075_v25 }
 0x119   :  { %816 = vst.msk [vmem:[#allocation11 + $0xd] sm:$0x1] %vm612_vm2, %v768_v44  ;;  %v695_v12 = vpop.xlane.xlu0 %694 }
 0x11a   :  { %v772_v55 = vrot.slane %v695_v12, %v2072_v16 }
 0x11b   :  { %v704_v31 = vpop.xlane.xlu1 %703 }
 0x11c   :  { %v777_v22 = vsel %vm539_vm1, %v776_v23, %v772_v55  ;;  %v785_v63 = vrot.slane %v704_v31, %v2075_v25 }
 0x11d   :  { %817 = vst.msk [vmem:[#allocation11 + $0x11] sm:$0x1] %vm612_vm2, %v777_v22  ;;  %v701_v15 = vpop.xlane.xlu0 %700 }
 0x11e   :  { %v781_v21 = vrot.slane %v701_v15, %v2072_v16 }
 0x11f   :  { %v710_v59 = vpop.xlane.xlu1 %709 }
 0x120   :  { %v786_v58 = vsel %vm539_vm1, %v785_v63, %v781_v21  ;;  %v794_v24 = vrot.slane %v710_v59, %v2075_v25 }
 0x121   :  { %818 = vst.msk [vmem:[#allocation11 + $0x15] sm:$0x1] %vm612_vm2, %v786_v58  ;;  %v707_v40 = vpop.xlane.xlu0 %706 }
 0x122   :  { %v790_v37 = vrot.slane %v707_v40, %v2072_v16 }
 0x123   :  { %v716_v57 = vpop.xlane.xlu1 %715 }
 0x124   :  { %v795_v26 = vsel %vm539_vm1, %v794_v24, %v790_v37  ;;  %v803_v56 = vrot.slane %v716_v57, %v2075_v25 }
 0x125   :  { %819 = vst.msk [vmem:[#allocation11 + $0x19] sm:$0x1] %vm612_vm2, %v795_v26  ;;  %v713_v27 = vpop.xlane.xlu0 %712 }
 0x126   :  { %v799_v60 = vrot.slane %v713_v27, %v2072_v16 }
 0x127   :  { %v874_v42 = vpop.xlane.xlu1 %873 }
 0x128   :  { %v804_v0 = vsel %vm539_vm1, %v803_v56, %v799_v60  ;;  %v940_v35 = vrot.slane %v874_v42, %v2075_v25 }
 0x129   :  { %820 = vst.msk [vmem:[#allocation11 + $0x1d] sm:$0x1] %vm612_vm2, %v804_v0  ;;  %v871_v46 = vpop.xlane.xlu0 %870 }
 0x12a   :  { %v936_v43 = vrot.slane %v871_v46, %v2072_v16 }
 0x12b   :  { %v880_v33 = vpop.xlane.xlu1 %879 }
 0x12c   :  { %v941_v39 = vsel %vm539_vm1, %v940_v35, %v936_v43  ;;  %v949_v51 = vrot.slane %v880_v33, %v2075_v25 }
 0x12d   :  { %1013 = vst.msk [vmem:[#allocation11 + $0x2] sm:$0x1] %vm612_vm2, %v941_v39  ;;  %v877_v11 = vpop.xlane.xlu0 %876 }
 0x12e   :  { %v945_v10 = vrot.slane %v877_v11, %v2072_v16 }
 0x12f   :  { %v886_v52 = vpop.xlane.xlu1 %885 }
 0x130   :  { %v950_v34 = vsel %vm539_vm1, %v949_v51, %v945_v10  ;;  %v958_v20 = vrot.slane %v886_v52, %v2075_v25 }
 0x131   :  { %1014 = vst.msk [vmem:[#allocation11 + $0x6] sm:$0x1] %vm612_vm2, %v950_v34  ;;  %v883_v30 = vpop.xlane.xlu0 %882 }
 0x132   :  { %v954_v53 = vrot.slane %v883_v30, %v2072_v16 }
 0x133   :  { %v892_v61 = vpop.xlane.xlu1 %891 }
 0x134   :  { %v959_v9 = vsel %vm539_vm1, %v958_v20, %v954_v53  ;;  %v967_v29 = vrot.slane %v892_v61, %v2075_v25 }
 0x135   :  { %1015 = vst.msk [vmem:[#allocation11 + $0xa] sm:$0x1] %vm612_vm2, %v959_v9  ;;  %v889_v19 = vpop.xlane.xlu0 %888 }
 0x136   :  { %v963_v17 = vrot.slane %v889_v19, %v2072_v16 }
 0x137   :  { %v898_v38 = vpop.xlane.xlu1 %897 }
 0x138   :  { %v968_v62 = vsel %vm539_vm1, %v967_v29, %v963_v17  ;;  %v976_v47 = vrot.slane %v898_v38, %v2075_v25 }
 0x139   :  { %1016 = vst.msk [vmem:[#allocation11 + $0xe] sm:$0x1] %vm612_vm2, %v968_v62  ;;  %v895_v5 = vpop.xlane.xlu0 %894 }
 0x13a   :  { %v972_v1 = vrot.slane %v895_v5, %v2072_v16 }
 0x13b   :  { %v904_v48 = vpop.xlane.xlu1 %903 }
 0x13c   :  { %v977_v45 = vsel %vm539_vm1, %v976_v47, %v972_v1  ;;  %v985_v54 = vrot.slane %v904_v48, %v2075_v25 }
 0x13d   :  { %1017 = vst.msk [vmem:[#allocation11 + $0x12] sm:$0x1] %vm612_vm2, %v977_v45  ;;  %v901_v28 = vpop.xlane.xlu0 %900 }
 0x13e   :  { %v981_v32 = vrot.slane %v901_v28, %v2072_v16 }
 0x13f   :  { %v910_v7 = vpop.xlane.xlu1 %909 }
 0x140   :  { %v986_v36 = vsel %vm539_vm1, %v985_v54, %v981_v32  ;;  %v994_v4 = vrot.slane %v910_v7, %v2075_v25 }
 0x141   :  { %1018 = vst.msk [vmem:[#allocation11 + $0x16] sm:$0x1] %vm612_vm2, %v986_v36  ;;  %v907_v8 = vpop.xlane.xlu0 %906 }
 0x142   :  { %v990_v50 = vrot.slane %v907_v8, %v2072_v16 }
 0x143   :  { %v916_v13 = vpop.xlane.xlu1 %915 }
 0x144   :  { %v995_v18 = vsel %vm539_vm1, %v994_v4, %v990_v50  ;;  %v1003_v49 = vrot.slane %v916_v13, %v2075_v25 }
 0x145   :  { %1019 = vst.msk [vmem:[#allocation11 + $0x1a] sm:$0x1] %vm612_vm2, %v995_v18  ;;  %v913_v41 = vpop.xlane.xlu0 %912 }
 0x146   :  { %v999_v14 = vrot.slane %v913_v41, %v2072_v16 }
 0x147   :  { %v1074_v6 = vpop.xlane.xlu1 %1073 }
 0x148   :  { %v1004_v2 = vsel %vm539_vm1, %v1003_v49, %v999_v14  ;;  %v1140_v3 = vrot.slane %v1074_v6, %v2075_v25 }
 0x149   :  { %1020 = vst.msk [vmem:[#allocation11 + $0x1e] sm:$0x1] %vm612_vm2, %v1004_v2  ;;  %v1071_v44 = vpop.xlane.xlu0 %1070 }
 0x14a   :  { %v1136_v23 = vrot.slane %v1071_v44, %v2072_v16 }
 0x14b   :  { %v1080_v12 = vpop.xlane.xlu1 %1079 }
 0x14c   :  { %v1141_v55 = vsel %vm539_vm1, %v1140_v3, %v1136_v23  ;;  %v1149_v31 = vrot.slane %v1080_v12, %v2075_v25 }
 0x14d   :  { %1213 = vst.msk [vmem:[#allocation11 + $0x3] sm:$0x1] %vm612_vm2, %v1141_v55  ;;  %v1077_v22 = vpop.xlane.xlu0 %1076 }
 0x14e   :  { %v1145_v63 = vrot.slane %v1077_v22, %v2072_v16 }
 0x14f   :  { %v1086_v15 = vpop.xlane.xlu1 %1085 }
 0x150   :  { %v1150_v21 = vsel %vm539_vm1, %v1149_v31, %v1145_v63  ;;  %v1158_v59 = vrot.slane %v1086_v15, %v2075_v25 }
 0x151   :  { %1214 = vst.msk [vmem:[#allocation11 + $0x7] sm:$0x1] %vm612_vm2, %v1150_v21  ;;  %v1083_v58 = vpop.xlane.xlu0 %1082 }
 0x152   :  { %v1154_v24 = vrot.slane %v1083_v58, %v2072_v16 }
 0x153   :  { %v1092_v40 = vpop.xlane.xlu1 %1091 }
 0x154   :  { %v1159_v37 = vsel %vm539_vm1, %v1158_v59, %v1154_v24  ;;  %v1167_v57 = vrot.slane %v1092_v40, %v2075_v25 }
 0x155   :  { %1215 = vst.msk [vmem:[#allocation11 + $0xb] sm:$0x1] %vm612_vm2, %v1159_v37  ;;  %v1089_v26 = vpop.xlane.xlu0 %1088 }
 0x156   :  { %v1163_v56 = vrot.slane %v1089_v26, %v2072_v16 }
 0x157   :  { %v1098_v27 = vpop.xlane.xlu1 %1097 }
 0x158   :  { %v1168_v60 = vsel %vm539_vm1, %v1167_v57, %v1163_v56  ;;  %v1176_v42 = vrot.slane %v1098_v27, %v2075_v25 }
 0x159   :  { %1216 = vst.msk [vmem:[#allocation11 + $0xf] sm:$0x1] %vm612_vm2, %v1168_v60  ;;  %v1095_v0 = vpop.xlane.xlu0 %1094 }
 0x15a   :  { %v1172_v35 = vrot.slane %v1095_v0, %v2072_v16 }
 0x15b   :  { %v1104_v46 = vpop.xlane.xlu1 %1103 }
 0x15c   :  { %v1177_v43 = vsel %vm539_vm1, %v1176_v42, %v1172_v35  ;;  %v1185_v33 = vrot.slane %v1104_v46, %v2075_v25 }
 0x15d   :  { %1217 = vst.msk [vmem:[#allocation11 + $0x13] sm:$0x1] %vm612_vm2, %v1177_v43  ;;  %v1101_v39 = vpop.xlane.xlu0 %1100 }
 0x15e   :  { %v1181_v51 = vrot.slane %v1101_v39, %v2072_v16 }
 0x15f   :  { %v1110_v11 = vpop.xlane.xlu1 %1109 }
 0x160   :  { %v1186_v10 = vsel %vm539_vm1, %v1185_v33, %v1181_v51  ;;  %v1194_v52 = vrot.slane %v1110_v11, %v2075_v25 }
 0x161   :  { %1218 = vst.msk [vmem:[#allocation11 + $0x17] sm:$0x1] %vm612_vm2, %v1186_v10  ;;  %v1107_v34 = vpop.xlane.xlu0 %1106 }
 0x162   :  { %v1190_v20 = vrot.slane %v1107_v34, %v2072_v16 }
 0x163   :  { %v1116_v30 = vpop.xlane.xlu1 %1115 }
 0x164   :  { %v1195_v53 = vsel %vm539_vm1, %v1194_v52, %v1190_v20  ;;  %v1203_v61 = vrot.slane %v1116_v30, %v2075_v25 }
 0x165   :  { %1219 = vst.msk [vmem:[#allocation11 + $0x1b] sm:$0x1] %vm612_vm2, %v1195_v53  ;;  %v1113_v9 = vpop.xlane.xlu0 %1112 }
 0x166   :  { %v1199_v29 = vrot.slane %v1113_v9, %v2072_v16 }
 0x168   :  { %v1204_v19 = vsel %vm539_vm1, %v1203_v61, %v1199_v29 }
 0x169   :  { %1220 = vst.msk [vmem:[#allocation11 + $0x1f] sm:$0x1] %vm612_vm2, %v1204_v19 }
 0x16a   :  { %1347 = shalt.err (!%p1344_p2)
}
 0x16b   :  { %s1348_s23 = scalar_lea.hbm %s2224_s4, 512 }
 0x16c   :  { %p1349_p3 = scmp.ne.s32.totalorder %s2224_s4, %s1348_s23  ;;  %p1352_p4 = scmp.lt.u32.totalorder %s1348_s23, %s2224_s4 }
 0x16e   :  { %p1354_p5 = pnand %p1352_p4, %p1349_p3 }
 0x170   :  { %1357 = shalt.err (!%p1354_p5)
}
 0x171   :  { %1232 = dma.vmem_to_hbm [thread:$0]  %s1227_s19, 512, %s2224_s4, [#allocation4], %s1369_s25, %s1369_s25, %s1370_s26  }
 0x172   :  { %1366 = dma.done.wait [#allocation4], 512  }
 0x173   :  { %1367 = vsyncadd [#allocation4], 4294966784 }
 0x174   :  { %1236 = vsyncpa [#allocation3], 1 }
 0x175   :  { %1237 = vsyncpa [#allocation7], 1 }
 0x176   :  { %1238 = vsyncpa [#allocation4], 1 }
 0x177   :  { %1239 = vsyncpa [#allocation5], 1 }
 0x178   :  { %1240 = vsyncpa [#allocation10], 1 }

</bundles_post_ra>
